<compile_context>
chip_gen: v6e
topology: v6e:2x2x1
jax: 0.10.0
libtpu: 0.0.40
codegen_flags: <defaults>
</compile_context>

<pallas_src>
import functools
import math

import jax
import jax.numpy as jnp
from jax.experimental import pallas as pl
from jax.experimental.pallas import tpu as pltpu

_EPS = 1e-5


# ---------------------------------------------------------------------------
# Per-generation VMEM budget + fused-path working-set estimate
# ---------------------------------------------------------------------------
def _vmem_limit_bytes():
    """~85% of physical VMEM (v5e/v6e: ~108 MiB of 128; v7x: ~54 MiB of 64)."""
    cap = 64 * 1024 * 1024                      # conservative fallback (v7x size)
    try:
        cap = int(getattr(pltpu.get_tpu_info(), "vmem_capacity_bytes", cap))
    except Exception:
        pass
    return int(cap * 0.85)


def _fused_workset_bytes(channels, r, small):
    """Generous estimate of the fused kernel's live VMEM footprint."""
    c_max = max(channels)
    live = 4 if small else 8                    # activation + matmul out + [v;v*v] + temps
    act = 4 * r * (channels[0] + channels[-1] + live * c_max)
    par = 0
    for cin, cout in zip(channels[:-1], channels[1:]):
        rows = cout if small else 4 * cout
        par += 4 * (rows * max(128, cin, cout) + cout * 128)   # incl. lane padding
    return act + par


# ---------------------------------------------------------------------------
# Fused encoder kernel: all ConvBlocks in one pallas_call
# ---------------------------------------------------------------------------
def _encoder_kernel(n_blocks, small, seq_len, n_batch, io_3d, precision, *refs):
    x_ref, o_ref = refs[0], refs[-1]
    param_refs = refs[1:-1]                     # (W, bn) per block

    # ---- load input, lane-dense (C0, N*L) ---------------------------------
    if io_3d:
        # x_ref is (N, C0, L): rearrange on-chip (saves the wrapper-transpose
        # HBM round trip).  Lane concat offsets are 128-aligned (L % 128 == 0).
        y = jnp.concatenate([x_ref[b] for b in range(n_batch)], axis=1)
    else:
        y = x_ref[...]                          # already (C0, N*L)
    r = y.shape[1]
    inv_r = 1.0 / r

    # ---- hoisted per-sequence boundary masks (float multiply, not select) --
    if not small:
        pos = jax.lax.broadcasted_iota(jnp.int32, (1, r), 1) % seq_len
        keep_l = (pos != 0).astype(jnp.float32)             # no left neighbour
        keep_r = (pos != seq_len - 1).astype(jnp.float32)   # no right neighbour

    def lane_shift(a, amount, keep):
        # Circular lane rotation (XLU slot, no VMEM copies) + boundary zeroing.
        if r % 128 == 0:
            rolled = pltpu.roll(a, amount % r, axis=1)
        else:
            rolled = jnp.roll(a, amount, axis=1)
        return rolled * keep

    def bn_gelu(v, gamma, beta):
        # Training-mode BatchNorm1d, one-pass stats; both per-channel
        # reductions fused into a single cross-lane reduce of [v ; v*v].
        c = v.shape[0]
        stats = jnp.sum(jnp.concatenate([v, v * v], axis=0),
                        axis=1, keepdims=True) * inv_r       # (2c, 1)
        mean, mean_sq = stats[:c], stats[c:]
        var = mean_sq - mean * mean
        scale = gamma * jax.lax.rsqrt(var + _EPS)
        shift = beta - mean * scale
        # tanh-approx GELU (EUP); |err| vs exact erf GELU < ~1e-3 (documented).
        return jax.nn.gelu(v * scale + shift, approximate=True)

    for b in range(n_blocks):                   # unrolled at trace time
        w_ref = param_refs[2 * b]               # packed weights
        bn_ref = param_refs[2 * b + 1]          # (Cout, 2|4): g1, be1[, g2, be2]
        cin = y.shape[0]
        cout = bn_ref.shape[0]

        # Conv1d(k=1): pointwise matmul.  Conv bias omitted: exactly cancelled
        # by the training-mode BN mean subtraction that follows.
        y = jnp.dot(w_ref[0:cout, 0:cin], y,
                    preferred_element_type=jnp.float32, precision=precision)
        y = bn_gelu(y, bn_ref[:, 0:1], bn_ref[:, 1:2])

        if not small:
            # Conv1d(k=3, pad=1): the three taps are ONE fused matmul against
            # the stacked (3*Cout, Cout) weight, then prev/next row-blocks are
            # lane-rolled + masked and accumulated sequentially.
            zz = jnp.dot(w_ref[cout:4 * cout, 0:cout], y,
                         preferred_element_type=jnp.float32, precision=precision)
            z = zz[cout:2 * cout]                               # centre tap
            z = z + lane_shift(zz[0:cout], 1, keep_l)           # tap l-1
            z = z + lane_shift(zz[2 * cout:3 * cout], -1, keep_r)  # tap l+1
            y = bn_gelu(z, bn_ref[:, 2:3], bn_ref[:, 3:4])

    # ---- store output ------------------------------------------------------
    if io_3d:
        for b in range(n_batch):                # lane-aligned slices (L % 128 == 0)
            o_ref[b] = y[:, b * seq_len:(b + 1) * seq_len]
    else:
        o_ref[...] = y                          # lane-dense (C_last, N*L)


# ---------------------------------------------------------------------------
# Host wrapper
# ---------------------------------------------------------------------------
def _pack_block_params(p, small):
    """One weight tensor + one BN tensor per block (fewer tiny DMAs)."""
    w1 = p["w1"].astype(jnp.float32)
    cout, cin = w1.shape
    if small:
        w = w1                                                  # (Cout, Cin)
        bn = jnp.stack([p["g1"], p["be1"]], axis=1)
    else:
        maxc = max(cin, cout)
        w = jnp.zeros((4 * cout, maxc), jnp.float32)            # w1 + stacked w2
        w = w.at[0:cout, 0:cin].set(w1)
        w = w.at[cout:4 * cout, 0:cout].set(
            p["w2"].astype(jnp.float32).reshape(3 * cout, cout))
        bn = jnp.stack([p["g1"], p["be1"], p["g2"], p["be2"]], axis=1)
    return w, bn.astype(jnp.float32)


def encoder_forward(x_ncl, params, small):
    """x_ncl: (N, C0, L) as in PyTorch; returns (N, C_last, L)."""
    n, c0, seq_len = x_ncl.shape
    r = n * seq_len
    channels = [c0] + [p["w1"].shape[0] for p in params]
    c_last = channels[-1]

    # HIGHEST is free at tiny channel counts (VALU/EUP-bound) and keeps the
    # f32 reference match tight; DEFAULT once the MXU work becomes non-trivial.
    precision = (jax.lax.Precision.HIGHEST if max(channels) <= 32
                 else jax.lax.Precision.DEFAULT)

    # Lane-aligned sequences -> do the NCL <-> (C, N*L) plumbing in-kernel.
    io_3d = (seq_len % 128 == 0)

    x = x_ncl.astype(jnp.float32)
    if io_3d:
        x_in = x                                                 # (N, C0, L)
        out_shape = jax.ShapeDtypeStruct((n, c_last, seq_len), jnp.float32)
    else:
        # Fallback: wrapper-side layout plumbing (extra HBM round trip).
        x_in = jnp.transpose(x, (1, 0, 2)).reshape(c0, r)
        out_shape = jax.ShapeDtypeStruct((c_last, r), jnp.float32)

    kernel_args = [x_in]
    for p in params:
        w, bn = _pack_block_params(p, small)
        kernel_args += [w, bn]

    vmem_limit = _vmem_limit_bytes()
    workset = _fused_workset_bytes(channels, r, small)
    if workset > vmem_limit:
        # TODO(synk): gridded two-pass-per-block fallback (pass 1 accumulates
        # per-channel sum/sumsq over R-tiles, pass 2 normalizes + GELU + conv)
        # with the R-tile axis marked "parallel" so v7x uses both TensorCores.
        raise ValueError(
            f"fused encoder working set (~{workset} B) exceeds the VMEM budget "
            f"({vmem_limit} B); tiled two-pass fallback not implemented")

    vmem = pl.BlockSpec(memory_space=pltpu.MemorySpace.VMEM)
    kernel = functools.partial(_encoder_kernel, len(params), small, seq_len, n,
                               io_3d, precision)

    out = pl.pallas_call(
        kernel,
        out_shape=out_shape,
        in_specs=[vmem] * len(kernel_args),
        out_specs=vmem,
        compiler_params=pltpu.CompilerParams(vmem_limit_bytes=vmem_limit),
    )(*kernel_args)

    if io_3d:
        return out                                               # (N, C_last, L)
    return jnp.transpose(out.reshape(c_last, n, seq_len), (1, 0, 2))


# ---------------------------------------------------------------------------
# Parameter init (matches PyTorch Conv1d / BatchNorm1d defaults)
# ---------------------------------------------------------------------------
def init_conv_block_params(key, cin, cout, small):
    k = jax.random.split(key, 4)
    bound1 = 1.0 / math.sqrt(cin * 1)
    p = dict(
        w1=jax.random.uniform(k[0], (cout, cin), jnp.float32, -bound1, bound1),
        b1=jax.random.uniform(k[1], (cout,), jnp.float32, -bound1, bound1),
        g1=jnp.ones((cout,), jnp.float32),
        be1=jnp.zeros((cout,), jnp.float32),
    )
    if not small:
        bound2 = 1.0 / math.sqrt(cout * 3)
        p.update(
            # w2[k] == torch conv2.weight[:, :, k]  (tap k of the size-3 kernel)
            w2=jax.random.uniform(k[2], (3, cout, cout), jnp.float32, -bound2, bound2),
            b2=jax.random.uniform(k[3], (cout,), jnp.float32, -bound2, bound2),
            g2=jnp.ones((cout,), jnp.float32),
            be2=jnp.zeros((cout,), jnp.float32),
        )
    return p


def init_encoder_params(key, channels, small):
    keys = jax.random.split(key, len(channels) - 1)
    return [init_conv_block_params(keys[i], channels[i], channels[i + 1], small)
            for i in range(len(channels) - 1)]


# ---------------------------------------------------------------------------
# Plain-JAX reference (PyTorch semantics: conv biases, train-mode BN, GELU)
# ---------------------------------------------------------------------------
def _ref_forward(x_ncl, params, small, exact_gelu=True):
    n, c0, seq_len = x_ncl.shape
    x = jnp.transpose(x_ncl, (1, 0, 2)).reshape(c0, n * seq_len).astype(jnp.float32)
    prec = jax.lax.Precision.HIGHEST

    def gelu(v):
        if exact_gelu:                                   # nn.GELU() default
            return 0.5 * v * (1.0 + jax.scipy.special.erf(v / jnp.sqrt(2.0)))
        return jax.nn.gelu(v, approximate=True)

    def bn(v, g, be):
        mean = v.mean(axis=1, keepdims=True)
        var = ((v - mean) ** 2).mean(axis=1, keepdims=True)
        return (v - mean) / jnp.sqrt(var + _EPS) * g[:, None] + be[:, None]

    for p in params:
        cout = p["w1"].shape[0]
        y = jnp.dot(p["w1"], x, precision=prec) + p["b1"][:, None]
        y = gelu(bn(y, p["g1"], p["be1"]))
        if not small:
            y3 = y.reshape(cout, n, seq_len)
            yp = jnp.pad(y3[:, :, :-1], ((0, 0), (0, 0), (1, 0))).reshape(cout, -1)
            yn = jnp.pad(y3[:, :, 1:], ((0, 0), (0, 0), (0, 1))).reshape(cout, -1)
            z = (jnp.dot(p["w2"][0], yp, precision=prec)
                 + jnp.dot(p["w2"][1], y, precision=prec)
                 + jnp.dot(p["w2"][2], yn, precision=prec)
                 + p["b2"][:, None])
            y = gelu(bn(z, p["g2"], p["be2"]))
        x = y
    c_last = x.shape[0]
    return jnp.transpose(x.reshape(c_last, n, seq_len), (1, 0, 2))


# ---------------------------------------------------------------------------
if __name__ == "__main__":
    channels = [4, 8, 16]             # EncoderBlock(channels=[4, 8, 16], small=...)
    key = jax.random.PRNGKey(0)

    configs = [
        (False, 2, 128),   # not-small, lane-aligned L -> in-kernel NCL layout path
        (True, 2, 128),    # small ConvBlocks
        (False, 2, 64),    # L % 128 != 0 -> wrapper-transpose fallback path
    ]
    for idx, (small, n, seq_len) in enumerate(configs):
        kx, kp = jax.random.split(jax.random.fold_in(key, idx))
        x = jax.random.normal(kx, (n, channels[0], seq_len), jnp.float32)  # NCL
        params = init_encoder_params(kp, channels, small)

        out = jax.block_until_ready(encoder_forward(x, params, small))
        assert out.shape == (n, channels[-1], seq_len), out.shape

        # 1) structural check: same math with the same (tanh) GELU -> tight match
        ref_tanh = _ref_forward(x, params, small, exact_gelu=False)
        assert jnp.allclose(out, ref_tanh, atol=5e-4, rtol=5e-4), \
            float(jnp.abs(out - ref_tanh).max())

        # 2) check against exact PyTorch semantics (erf GELU, conv biases kept):
        #    only deviation is the documented tanh-GELU approximation (< 2e-3).
        ref_exact = _ref_forward(x, params, small, exact_gelu=True)
        assert jnp.allclose(out, ref_exact, atol=2e-3, rtol=2e-3), \
            float(jnp.abs(out - ref_exact).max())

    print("KERNEL_OK")
</pallas_src>

<mosaic_0001>
module attributes {stable_mosaic.version = 11 : i64} {
  func.func @_encoder_kernel(%arg0: memref<2x4x128xf32, #tpu.memory_space<vmem>>, %arg1: memref<32x8xf32, #tpu.memory_space<vmem>>, %arg2: memref<8x4xf32, #tpu.memory_space<vmem>>, %arg3: memref<64x16xf32, #tpu.memory_space<vmem>>, %arg4: memref<16x4xf32, #tpu.memory_space<vmem>>, %arg5: memref<2x16x128xf32, #tpu.memory_space<vmem>>) attributes {dimension_semantics = [], scalar_prefetch = 0 : i64, scratch_operands = 0 : i64, tpu.core_type = #tpu.core_type<tc>} {
    %c0 = arith.constant 0 : index
    %c0_0 = arith.constant 0 : index
    %c0_1 = arith.constant 0 : index
    %0 = vector.load %arg0[%c0, %c0_0, %c0_1] : memref<2x4x128xf32, #tpu.memory_space<vmem>>, vector<1x4x128xf32>
    %1 = vector.shape_cast %0 : vector<1x4x128xf32> to vector<4x128xf32>
    %c1 = arith.constant 1 : index
    %c0_2 = arith.constant 0 : index
    %c0_3 = arith.constant 0 : index
    %2 = vector.load %arg0[%c1, %c0_2, %c0_3] : memref<2x4x128xf32, #tpu.memory_space<vmem>>, vector<1x4x128xf32>
    %3 = vector.shape_cast %2 : vector<1x4x128xf32> to vector<4x128xf32>
    %4 = tpu.concatenate %1, %3 in 1 : vector<4x128xf32>, vector<4x128xf32> -> vector<4x256xf32>
    %5 = tpu.iota {dimensions = array<i32: 1>} : vector<1x256xi32>
    %c128_i32 = arith.constant 128 : i32
    %c0_i32 = arith.constant 0 : i32
    %6 = arith.cmpi eq, %c128_i32, %c0_i32 : i32
    %c1_i32 = arith.constant 1 : i32
    %7 = arith.select %6, %c1_i32, %c128_i32 : i32
    %8 = vector.broadcast %7 : i32 to vector<1x256xi32>
    %9 = arith.remsi %5, %8 : vector<1x256xi32>
    %c0_i32_4 = arith.constant 0 : i32
    %10 = vector.broadcast %c0_i32_4 : i32 to vector<1x256xi32>
    %11 = arith.cmpi ne, %9, %10 : vector<1x256xi32>
    %c0_i32_5 = arith.constant 0 : i32
    %12 = vector.broadcast %c0_i32_5 : i32 to vector<1x256xi32>
    %13 = arith.cmpi slt, %9, %12 : vector<1x256xi32>
    %c0_i32_6 = arith.constant 0 : i32
    %14 = arith.cmpi slt, %7, %c0_i32_6 : i32
    %15 = vector.broadcast %14 : i1 to vector<1x256xi1>
    %16 = vector.broadcast %15 : vector<1x256xi1> to vector<1x256xi1>
    %17 = arith.xori %13, %16 : vector<1x256xi1>
    %18 = arith.andi %17, %11 : vector<1x256xi1>
    %19 = vector.broadcast %7 : i32 to vector<1x256xi32>
    %20 = arith.addi %9, %19 : vector<1x256xi32>
    %21 = arith.select %18, %20, %9 : vector<1x256xi1>, vector<1x256xi32>
    %c0_i32_7 = arith.constant 0 : i32
    %22 = vector.broadcast %c0_i32_7 : i32 to vector<1x256xi32>
    %23 = arith.cmpi ne, %21, %22 : vector<1x256xi32>
    %24 = arith.extui %23 : vector<1x256xi1> to vector<1x256xi32>
    %25 = arith.sitofp %24 : vector<1x256xi32> to vector<1x256xf32>
    %c127_i32 = arith.constant 127 : i32
    %26 = vector.broadcast %c127_i32 : i32 to vector<1x256xi32>
    %27 = arith.cmpi ne, %21, %26 : vector<1x256xi32>
    %28 = arith.extui %27 : vector<1x256xi1> to vector<1x256xi32>
    %29 = arith.sitofp %28 : vector<1x256xi32> to vector<1x256xf32>
    %c0_8 = arith.constant 0 : index
    %c0_9 = arith.constant 0 : index
    %30 = vector.load %arg1[%c0_8, %c0_9] : memref<32x8xf32, #tpu.memory_space<vmem>>, vector<8x4xf32>
    %cst = arith.constant dense<0.000000e+00> : vector<8x256xf32>
    %31 = tpu.matmul %30, %4, %cst {dimension_numbers = #tpu.dot_dimension_numbers<[1], [0], [0], [1], [0, 0, 1, 1], [], []>, precision = #tpu.contract_precision<fp32>} : vector<8x4xf32>, vector<4x256xf32>, vector<8x256xf32> -> vector<8x256xf32>
    %c0_10 = arith.constant 0 : index
    %c0_11 = arith.constant 0 : index
    %32 = vector.load %arg2[%c0_10, %c0_11] : memref<8x4xf32, #tpu.memory_space<vmem>>, vector<8x1xf32>
    %c0_12 = arith.constant 0 : index
    %c1_13 = arith.constant 1 : index
    %33 = vector.load %arg2[%c0_12, %c1_13] : memref<8x4xf32, #tpu.memory_space<vmem>>, vector<8x1xf32>
    %34 = arith.mulf %31, %31 : vector<8x256xf32>
    %35 = tpu.concatenate %31, %34 in 0 : vector<8x256xf32>, vector<8x256xf32> -> vector<16x256xf32>
    %cst_14 = arith.constant dense<0.000000e+00> : vector<16xf32>
    %36 = vector.multi_reduction <add>, %35, %cst_14 [1] : vector<16x256xf32> to vector<16xf32>
    %37 = vector.shape_cast %36 : vector<16xf32> to vector<16x1xf32>
    %cst_15 = arith.constant 3.906250e-03 : f32
    %38 = vector.broadcast %cst_15 : f32 to vector<16x1xf32>
    %39 = arith.mulf %37, %38 : vector<16x1xf32>
    %40 = vector.extract_strided_slice %39 {offsets = [0, 0], sizes = [8, 1], strides = [1, 1]} : vector<16x1xf32> to vector<8x1xf32>
    %41 = vector.extract_strided_slice %39 {offsets = [8, 0], sizes = [8, 1], strides = [1, 1]} : vector<16x1xf32> to vector<8x1xf32>
    %42 = arith.mulf %40, %40 : vector<8x1xf32>
    %43 = arith.subf %41, %42 : vector<8x1xf32>
    %cst_16 = arith.constant 9.99999974E-6 : f32
    %44 = vector.broadcast %cst_16 : f32 to vector<8x1xf32>
    %45 = arith.addf %43, %44 : vector<8x1xf32>
    %46 = math.rsqrt %45 : vector<8x1xf32>
    %47 = arith.mulf %32, %46 : vector<8x1xf32>
    %48 = arith.mulf %40, %47 : vector<8x1xf32>
    %49 = arith.subf %33, %48 : vector<8x1xf32>
    %50 = vector.broadcast %47 : vector<8x1xf32> to vector<8x256xf32>
    %51 = arith.mulf %31, %50 : vector<8x256xf32>
    %52 = vector.broadcast %49 : vector<8x1xf32> to vector<8x256xf32>
    %53 = arith.addf %51, %52 : vector<8x256xf32>
    %54 = arith.mulf %53, %53 : vector<8x256xf32>
    %55 = arith.mulf %53, %54 : vector<8x256xf32>
    %cst_17 = arith.constant 4.471500e-02 : f32
    %56 = vector.broadcast %cst_17 : f32 to vector<8x256xf32>
    %57 = arith.mulf %56, %55 : vector<8x256xf32>
    %58 = arith.addf %53, %57 : vector<8x256xf32>
    %cst_18 = arith.constant 0.797884583 : f32
    %59 = vector.broadcast %cst_18 : f32 to vector<8x256xf32>
    %60 = arith.mulf %59, %58 : vector<8x256xf32>
    %61 = math.tanh %60 : vector<8x256xf32>
    %cst_19 = arith.constant 1.000000e+00 : f32
    %62 = vector.broadcast %cst_19 : f32 to vector<8x256xf32>
    %63 = arith.addf %62, %61 : vector<8x256xf32>
    %cst_20 = arith.constant 5.000000e-01 : f32
    %64 = vector.broadcast %cst_20 : f32 to vector<8x256xf32>
    %65 = arith.mulf %64, %63 : vector<8x256xf32>
    %66 = arith.mulf %53, %65 : vector<8x256xf32>
    %c8 = arith.constant 8 : index
    %c0_21 = arith.constant 0 : index
    %67 = vector.load %arg1[%c8, %c0_21] : memref<32x8xf32, #tpu.memory_space<vmem>>, vector<24x8xf32>
    %cst_22 = arith.constant dense<0.000000e+00> : vector<24x256xf32>
    %68 = tpu.matmul %67, %66, %cst_22 {dimension_numbers = #tpu.dot_dimension_numbers<[1], [0], [0], [1], [0, 0, 1, 1], [], []>, precision = #tpu.contract_precision<fp32>} : vector<24x8xf32>, vector<8x256xf32>, vector<24x256xf32> -> vector<24x256xf32>
    %69 = vector.extract_strided_slice %68 {offsets = [8, 0], sizes = [8, 256], strides = [1, 1]} : vector<24x256xf32> to vector<8x256xf32>
    %70 = vector.extract_strided_slice %68 {offsets = [0, 0], sizes = [8, 256], strides = [1, 1]} : vector<24x256xf32> to vector<8x256xf32>
    %c1_i32_23 = arith.constant 1 : i32
    %71 = tpu.dynamic_rotate %70 by %c1_i32_23 dim 1 : vector<8x256xf32>, i32 -> vector<8x256xf32>
    %72 = vector.broadcast %25 : vector<1x256xf32> to vector<8x256xf32>
    %73 = arith.mulf %71, %72 : vector<8x256xf32>
    %74 = arith.addf %69, %73 : vector<8x256xf32>
    %75 = vector.extract_strided_slice %68 {offsets = [16, 0], sizes = [8, 256], strides = [1, 1]} : vector<24x256xf32> to vector<8x256xf32>
    %c255_i32 = arith.constant 255 : i32
    %76 = tpu.dynamic_rotate %75 by %c255_i32 dim 1 : vector<8x256xf32>, i32 -> vector<8x256xf32>
    %77 = vector.broadcast %29 : vector<1x256xf32> to vector<8x256xf32>
    %78 = arith.mulf %76, %77 : vector<8x256xf32>
    %79 = arith.addf %74, %78 : vector<8x256xf32>
    %c0_24 = arith.constant 0 : index
    %c2 = arith.constant 2 : index
    %80 = vector.load %arg2[%c0_24, %c2] : memref<8x4xf32, #tpu.memory_space<vmem>>, vector<8x1xf32>
    %c0_25 = arith.constant 0 : index
    %c3 = arith.constant 3 : index
    %81 = vector.load %arg2[%c0_25, %c3] : memref<8x4xf32, #tpu.memory_space<vmem>>, vector<8x1xf32>
    %82 = arith.mulf %79, %79 : vector<8x256xf32>
    %83 = tpu.concatenate %79, %82 in 0 : vector<8x256xf32>, vector<8x256xf32> -> vector<16x256xf32>
    %cst_26 = arith.constant dense<0.000000e+00> : vector<16xf32>
    %84 = vector.multi_reduction <add>, %83, %cst_26 [1] : vector<16x256xf32> to vector<16xf32>
    %85 = vector.shape_cast %84 : vector<16xf32> to vector<16x1xf32>
    %cst_27 = arith.constant 3.906250e-03 : f32
    %86 = vector.broadcast %cst_27 : f32 to vector<16x1xf32>
    %87 = arith.mulf %85, %86 : vector<16x1xf32>
    %88 = vector.extract_strided_slice %87 {offsets = [0, 0], sizes = [8, 1], strides = [1, 1]} : vector<16x1xf32> to vector<8x1xf32>
    %89 = vector.extract_strided_slice %87 {offsets = [8, 0], sizes = [8, 1], strides = [1, 1]} : vector<16x1xf32> to vector<8x1xf32>
    %90 = arith.mulf %88, %88 : vector<8x1xf32>
    %91 = arith.subf %89, %90 : vector<8x1xf32>
    %cst_28 = arith.constant 9.99999974E-6 : f32
    %92 = vector.broadcast %cst_28 : f32 to vector<8x1xf32>
    %93 = arith.addf %91, %92 : vector<8x1xf32>
    %94 = math.rsqrt %93 : vector<8x1xf32>
    %95 = arith.mulf %80, %94 : vector<8x1xf32>
    %96 = arith.mulf %88, %95 : vector<8x1xf32>
    %97 = arith.subf %81, %96 : vector<8x1xf32>
    %98 = vector.broadcast %95 : vector<8x1xf32> to vector<8x256xf32>
    %99 = arith.mulf %79, %98 : vector<8x256xf32>
    %100 = vector.broadcast %97 : vector<8x1xf32> to vector<8x256xf32>
    %101 = arith.addf %99, %100 : vector<8x256xf32>
    %102 = arith.mulf %101, %101 : vector<8x256xf32>
    %103 = arith.mulf %101, %102 : vector<8x256xf32>
    %cst_29 = arith.constant 4.471500e-02 : f32
    %104 = vector.broadcast %cst_29 : f32 to vector<8x256xf32>
    %105 = arith.mulf %104, %103 : vector<8x256xf32>
    %106 = arith.addf %101, %105 : vector<8x256xf32>
    %cst_30 = arith.constant 0.797884583 : f32
    %107 = vector.broadcast %cst_30 : f32 to vector<8x256xf32>
    %108 = arith.mulf %107, %106 : vector<8x256xf32>
    %109 = math.tanh %108 : vector<8x256xf32>
    %cst_31 = arith.constant 1.000000e+00 : f32
    %110 = vector.broadcast %cst_31 : f32 to vector<8x256xf32>
    %111 = arith.addf %110, %109 : vector<8x256xf32>
    %cst_32 = arith.constant 5.000000e-01 : f32
    %112 = vector.broadcast %cst_32 : f32 to vector<8x256xf32>
    %113 = arith.mulf %112, %111 : vector<8x256xf32>
    %114 = arith.mulf %101, %113 : vector<8x256xf32>
    %c0_33 = arith.constant 0 : index
    %c0_34 = arith.constant 0 : index
    %115 = vector.load %arg3[%c0_33, %c0_34] : memref<64x16xf32, #tpu.memory_space<vmem>>, vector<16x8xf32>
    %cst_35 = arith.constant dense<0.000000e+00> : vector<16x256xf32>
    %116 = tpu.matmul %115, %114, %cst_35 {dimension_numbers = #tpu.dot_dimension_numbers<[1], [0], [0], [1], [0, 0, 1, 1], [], []>, precision = #tpu.contract_precision<fp32>} : vector<16x8xf32>, vector<8x256xf32>, vector<16x256xf32> -> vector<16x256xf32>
    %c0_36 = arith.constant 0 : index
    %c0_37 = arith.constant 0 : index
    %117 = vector.load %arg4[%c0_36, %c0_37] : memref<16x4xf32, #tpu.memory_space<vmem>>, vector<16x1xf32>
    %c0_38 = arith.constant 0 : index
    %c1_39 = arith.constant 1 : index
    %118 = vector.load %arg4[%c0_38, %c1_39] : memref<16x4xf32, #tpu.memory_space<vmem>>, vector<16x1xf32>
    %119 = arith.mulf %116, %116 : vector<16x256xf32>
    %120 = tpu.concatenate %116, %119 in 0 : vector<16x256xf32>, vector<16x256xf32> -> vector<32x256xf32>
    %cst_40 = arith.constant dense<0.000000e+00> : vector<32xf32>
    %121 = vector.multi_reduction <add>, %120, %cst_40 [1] : vector<32x256xf32> to vector<32xf32>
    %122 = vector.shape_cast %121 : vector<32xf32> to vector<32x1xf32>
    %cst_41 = arith.constant 3.906250e-03 : f32
    %123 = vector.broadcast %cst_41 : f32 to vector<32x1xf32>
    %124 = arith.mulf %122, %123 : vector<32x1xf32>
    %125 = vector.extract_strided_slice %124 {offsets = [0, 0], sizes = [16, 1], strides = [1, 1]} : vector<32x1xf32> to vector<16x1xf32>
    %126 = vector.extract_strided_slice %124 {offsets = [16, 0], sizes = [16, 1], strides = [1, 1]} : vector<32x1xf32> to vector<16x1xf32>
    %127 = arith.mulf %125, %125 : vector<16x1xf32>
    %128 = arith.subf %126, %127 : vector<16x1xf32>
    %cst_42 = arith.constant 9.99999974E-6 : f32
    %129 = vector.broadcast %cst_42 : f32 to vector<16x1xf32>
    %130 = arith.addf %128, %129 : vector<16x1xf32>
    %131 = math.rsqrt %130 : vector<16x1xf32>
    %132 = arith.mulf %117, %131 : vector<16x1xf32>
    %133 = arith.mulf %125, %132 : vector<16x1xf32>
    %134 = arith.subf %118, %133 : vector<16x1xf32>
    %135 = vector.broadcast %132 : vector<16x1xf32> to vector<16x256xf32>
    %136 = arith.mulf %116, %135 : vector<16x256xf32>
    %137 = vector.broadcast %134 : vector<16x1xf32> to vector<16x256xf32>
    %138 = arith.addf %136, %137 : vector<16x256xf32>
    %139 = arith.mulf %138, %138 : vector<16x256xf32>
    %140 = arith.mulf %138, %139 : vector<16x256xf32>
    %cst_43 = arith.constant 4.471500e-02 : f32
    %141 = vector.broadcast %cst_43 : f32 to vector<16x256xf32>
    %142 = arith.mulf %141, %140 : vector<16x256xf32>
    %143 = arith.addf %138, %142 : vector<16x256xf32>
    %cst_44 = arith.constant 0.797884583 : f32
    %144 = vector.broadcast %cst_44 : f32 to vector<16x256xf32>
    %145 = arith.mulf %144, %143 : vector<16x256xf32>
    %146 = math.tanh %145 : vector<16x256xf32>
    %cst_45 = arith.constant 1.000000e+00 : f32
    %147 = vector.broadcast %cst_45 : f32 to vector<16x256xf32>
    %148 = arith.addf %147, %146 : vector<16x256xf32>
    %cst_46 = arith.constant 5.000000e-01 : f32
    %149 = vector.broadcast %cst_46 : f32 to vector<16x256xf32>
    %150 = arith.mulf %149, %148 : vector<16x256xf32>
    %151 = arith.mulf %138, %150 : vector<16x256xf32>
    %c16 = arith.constant 16 : index
    %c0_47 = arith.constant 0 : index
    %152 = vector.load %arg3[%c16, %c0_47] : memref<64x16xf32, #tpu.memory_space<vmem>>, vector<48x16xf32>
    %cst_48 = arith.constant dense<0.000000e+00> : vector<48x256xf32>
    %153 = tpu.matmul %152, %151, %cst_48 {dimension_numbers = #tpu.dot_dimension_numbers<[1], [0], [0], [1], [0, 0, 1, 1], [], []>, precision = #tpu.contract_precision<fp32>} : vector<48x16xf32>, vector<16x256xf32>, vector<48x256xf32> -> vector<48x256xf32>
    %154 = vector.extract_strided_slice %153 {offsets = [16, 0], sizes = [16, 256], strides = [1, 1]} : vector<48x256xf32> to vector<16x256xf32>
    %155 = vector.extract_strided_slice %153 {offsets = [0, 0], sizes = [16, 256], strides = [1, 1]} : vector<48x256xf32> to vector<16x256xf32>
    %c1_i32_49 = arith.constant 1 : i32
    %156 = tpu.dynamic_rotate %155 by %c1_i32_49 dim 1 : vector<16x256xf32>, i32 -> vector<16x256xf32>
    %157 = vector.broadcast %25 : vector<1x256xf32> to vector<16x256xf32>
    %158 = arith.mulf %156, %157 : vector<16x256xf32>
    %159 = arith.addf %154, %158 : vector<16x256xf32>
    %160 = vector.extract_strided_slice %153 {offsets = [32, 0], sizes = [16, 256], strides = [1, 1]} : vector<48x256xf32> to vector<16x256xf32>
    %c255_i32_50 = arith.constant 255 : i32
    %161 = tpu.dynamic_rotate %160 by %c255_i32_50 dim 1 : vector<16x256xf32>, i32 -> vector<16x256xf32>
    %162 = vector.broadcast %29 : vector<1x256xf32> to vector<16x256xf32>
    %163 = arith.mulf %161, %162 : vector<16x256xf32>
    %164 = arith.addf %159, %163 : vector<16x256xf32>
    %c0_51 = arith.constant 0 : index
    %c2_52 = arith.constant 2 : index
    %165 = vector.load %arg4[%c0_51, %c2_52] : memref<16x4xf32, #tpu.memory_space<vmem>>, vector<16x1xf32>
    %c0_53 = arith.constant 0 : index
    %c3_54 = arith.constant 3 : index
    %166 = vector.load %arg4[%c0_53, %c3_54] : memref<16x4xf32, #tpu.memory_space<vmem>>, vector<16x1xf32>
    %167 = arith.mulf %164, %164 : vector<16x256xf32>
    %168 = tpu.concatenate %164, %167 in 0 : vector<16x256xf32>, vector<16x256xf32> -> vector<32x256xf32>
    %cst_55 = arith.constant dense<0.000000e+00> : vector<32xf32>
    %169 = vector.multi_reduction <add>, %168, %cst_55 [1] : vector<32x256xf32> to vector<32xf32>
    %170 = vector.shape_cast %169 : vector<32xf32> to vector<32x1xf32>
    %cst_56 = arith.constant 3.906250e-03 : f32
    %171 = vector.broadcast %cst_56 : f32 to vector<32x1xf32>
    %172 = arith.mulf %170, %171 : vector<32x1xf32>
    %173 = vector.extract_strided_slice %172 {offsets = [0, 0], sizes = [16, 1], strides = [1, 1]} : vector<32x1xf32> to vector<16x1xf32>
    %174 = vector.extract_strided_slice %172 {offsets = [16, 0], sizes = [16, 1], strides = [1, 1]} : vector<32x1xf32> to vector<16x1xf32>
    %175 = arith.mulf %173, %173 : vector<16x1xf32>
    %176 = arith.subf %174, %175 : vector<16x1xf32>
    %cst_57 = arith.constant 9.99999974E-6 : f32
    %177 = vector.broadcast %cst_57 : f32 to vector<16x1xf32>
    %178 = arith.addf %176, %177 : vector<16x1xf32>
    %179 = math.rsqrt %178 : vector<16x1xf32>
    %180 = arith.mulf %165, %179 : vector<16x1xf32>
    %181 = arith.mulf %173, %180 : vector<16x1xf32>
    %182 = arith.subf %166, %181 : vector<16x1xf32>
    %183 = vector.broadcast %180 : vector<16x1xf32> to vector<16x256xf32>
    %184 = arith.mulf %164, %183 : vector<16x256xf32>
    %185 = vector.broadcast %182 : vector<16x1xf32> to vector<16x256xf32>
    %186 = arith.addf %184, %185 : vector<16x256xf32>
    %187 = arith.mulf %186, %186 : vector<16x256xf32>
    %188 = arith.mulf %186, %187 : vector<16x256xf32>
    %cst_58 = arith.constant 4.471500e-02 : f32
    %189 = vector.broadcast %cst_58 : f32 to vector<16x256xf32>
    %190 = arith.mulf %189, %188 : vector<16x256xf32>
    %191 = arith.addf %186, %190 : vector<16x256xf32>
    %cst_59 = arith.constant 0.797884583 : f32
    %192 = vector.broadcast %cst_59 : f32 to vector<16x256xf32>
    %193 = arith.mulf %192, %191 : vector<16x256xf32>
    %194 = math.tanh %193 : vector<16x256xf32>
    %cst_60 = arith.constant 1.000000e+00 : f32
    %195 = vector.broadcast %cst_60 : f32 to vector<16x256xf32>
    %196 = arith.addf %195, %194 : vector<16x256xf32>
    %cst_61 = arith.constant 5.000000e-01 : f32
    %197 = vector.broadcast %cst_61 : f32 to vector<16x256xf32>
    %198 = arith.mulf %197, %196 : vector<16x256xf32>
    %199 = arith.mulf %186, %198 : vector<16x256xf32>
    %200 = vector.extract_strided_slice %199 {offsets = [0, 0], sizes = [16, 128], strides = [1, 1]} : vector<16x256xf32> to vector<16x128xf32>
    %c0_62 = arith.constant 0 : index
    %c0_63 = arith.constant 0 : index
    %c0_64 = arith.constant 0 : index
    %201 = vector.load %arg5[%c0_62, %c0_63, %c0_64] : memref<2x16x128xf32, #tpu.memory_space<vmem>>, vector<1x16x128xf32>
    %202 = vector.shape_cast %201 : vector<1x16x128xf32> to vector<16x128xf32>
    %203 = vector.shape_cast %200 : vector<16x128xf32> to vector<1x16x128xf32>
    tpu.vector_store %arg5[%c0_62, %c0_63, %c0_64], %203 {strides = array<i32>} : memref<2x16x128xf32, #tpu.memory_space<vmem>>, vector<1x16x128xf32>,
    %204 = vector.extract_strided_slice %199 {offsets = [0, 128], sizes = [16, 128], strides = [1, 1]} : vector<16x256xf32> to vector<16x128xf32>
    %c1_65 = arith.constant 1 : index
    %c0_66 = arith.constant 0 : index
    %c0_67 = arith.constant 0 : index
    %205 = vector.load %arg5[%c1_65, %c0_66, %c0_67] : memref<2x16x128xf32, #tpu.memory_space<vmem>>, vector<1x16x128xf32>
    %206 = vector.shape_cast %205 : vector<1x16x128xf32> to vector<16x128xf32>
    %207 = vector.shape_cast %204 : vector<16x128xf32> to vector<1x16x128xf32>
    tpu.vector_store %arg5[%c1_65, %c0_66, %c0_67], %207 {strides = array<i32>} : memref<2x16x128xf32, #tpu.memory_space<vmem>>, vector<1x16x128xf32>,
    return
  }
}

</mosaic_0001>

<bundles_post_ra>
// kernel: tpu_custom_call.1
= control target key start
LH: loop header
LB: loop body
LE: loop exit
PB: predicated region body
PF: predicated region fallthrough
CT: control target
= control target key end

     0   :  { %vm68_vm0 = vcmask 1043456   ;;  %v2887_v4 = vmov 0.0   ;;  %vm64_vm1 = vcmask 31744   ;;  %s3364_s0 = inlined_call_operand.vmem [shape: f32[2,4,128], index: 0, kind: input, shape index: {}]   ;;  %s3365_s1 = inlined_call_operand.vmem [shape: f32[32,8], index: 1, kind: input, shape index: {}]   ;;  %s3366_s2 = inlined_call_operand.vmem [shape: f32[8,4], index: 2, kind: input, shape index: {}]   ;;  %s3367_s3 = inlined_call_operand.vmem [shape: f32[64,16], index: 3, kind: input, shape index: {}]   ;;  %s3368_s4 = inlined_call_operand.vmem [shape: f32[16,4], index: 4, kind: input, shape index: {}]   ;;  %s3369_s5 = inlined_call_operand.hbm [shape: f32[2,16,128], index: 5, kind: output, shape index: {}]  }
   0x1   :  { %v2803_v0 = vld [vmem:[%s3364_s0 + $0x4] sm:$0xf]  ;;  %v21_v1 = vld [vmem:[%s3364_s0] sm:$0xf]  ;;  %141 = vmatprep.mubr.f32.mxu0 %v2887_v4  ;;  %227 = vmatprep.mubr.f32.mxu1 %v2887_v4 }
   0x2   :  { %v73_v2 = vsel %vm68_vm0, %v2803_v0, 0  ;;  %v70_v3 = vsel %vm68_vm0, %v21_v1, 0  ;;  %v63_v5 = vld [vmem:[%s3365_s1] sm:$0xff] }
   0x3   :  { %10 = vsyncpa [#allocation3], 0  ;;  %v105_v6 = vand.u32 4294901760, %v73_v2  ;;  %v107_v7 = vand.u32 4294901760, %v70_v3  ;;  %v66_v8 = vsel %vm64_vm1, %v63_v5, 0  ;;  %v2888_v48 = vmov 0  }
   0x4   :  { %v142_v9 = vand.u32 4294901760, %v66_v8  ;;  %2818 = vset.pattern.permute.xlu1 %v2888_v48  ;;  %v2889_v56 = vmov 1   ;;  %v2949_v57 = vld [vmem:[%s3366_s2] sm:$0xff]  ;;  %s2890_s25 = smov 1   ;;  %vm597_vm2 = vcmask 64512   ;;  %vm1881_vm9 = vcmask 130048  }
   0x5   :  { %106 = vmatprep.subr.mxu0 %v105_v6  ;;  %v184_v10 = vsub.f32 %v73_v2, %v105_v6  ;;  %v190_v11 = vsub.f32 %v70_v3, %v107_v7  ;;  %2819 = vset.pattern.permute.xlu0 %v2889_v56 }
   0x6   :  { %108 = vmatpush1.msra.mxu0 %v107_v7  ;;  %v143_v12 = vsub.f32 %v66_v8, %v142_v9 }
   0x7   :  { %v185_v13 = vand.u32 4294901760, %v184_v10  ;;  %v191_v14 = vand.u32 4294901760, %v190_v11  ;;  %267 = vmatprep.subr.mxu0 %v184_v10 }
   0x8   :  { %v144_v15 = vand.u32 4294901760, %v143_v12 }
   0x9   :  { %v186_v16 = vsub.f32 %v184_v10, %v185_v13  ;;  %v192_v17 = vsub.f32 %v190_v11, %v191_v14 }
   0xa   :  { %v145_v18 = vsub.f32 %v143_v12, %v144_v15 }
   0xb   :  { %v187_v19 = vand.u32 4294901760, %v186_v16  ;;  %v193_v20 = vand.u32 4294901760, %v192_v17  ;;  %v594_v16 = vld [vmem:[%s3365_s1 + $0x8] sm:$0xff] }
   0xc   :  { %v146_v21 = vand.u32 4294901760, %v145_v18  ;;  %v599_v17 = vsel %vm597_vm2, %v594_v16, 0  ;;  %v595_v18 = vld [vmem:[%s3365_s1 + $0x10] sm:$0xff] }
   0xd   :  { %188 = vmatprep.subr.mxu1 %v187_v19  ;;  %v2962_v19 = vand.u32 4294901760, %v599_v17 }
   0xe   :  { %147 = vmatmul.mubr.f32.vlgmr.msra.gmra.mxu0 %v146_v21  ;;  %194 = vmatpush1.msra.mxu1 %v193_v20  ;;  %v602_v20 = vsel %vm597_vm2, %v595_v18, 0  ;;  %v596_v21 = vld [vmem:[%s3365_s1 + $0x18] sm:$0xff]  ;;  %s2891_s1 = smov 127  }
   0xf   :  { %229 = vmatmul.mubr.f32.vlgmr.msra.gmra.mxu1 %v142_v9  ;;  %270 = vmatpush1.msra.mxu0 %v190_v11 }
  0x10   :  { %303 = vmatprep.mubr.f32.mxu0 %v2887_v4  ;;  %343 = vmatprep.subr.mxu1 %v105_v6 }
  0x11   :  { %345 = vmatpush1.msra.mxu1 %v107_v7  ;;  %378 = vmatprep.mubr.f32.mxu1 %v2887_v4 }
  0x12   :  { %306 = vmatmul.mubr.f32.vlgmr.msra.gmra.mxu0 %v143_v12  ;;  %421 = vmatprep.subr.mxu0 %v185_v13 }
  0x13   :  { %382 = vmatmul.mubr.f32.vlgmr.msra.gmra.mxu1 %v144_v15  ;;  %425 = vmatpush1.msra.mxu0 %v191_v14 }
  0x14   :  { %458 = vmatprep.mubr.f32.mxu0 %v2887_v4  ;;  %497 = vmatprep.subr.mxu1 %v105_v6 }
  0x15   :  { %499 = vmatpush1.msra.mxu1 %v107_v7  ;;  %532 = vmatprep.mubr.f32.mxu1 %v2887_v4 }
  0x16   :  { %460 = vmatmul.mubr.f32.vlgmr.msra.gmra.mxu0 %v142_v9 }
  0x17   :  { %534 = vmatmul.mubr.f32.vlgmr.msra.gmra.mxu1 %v142_v9  ;;  %673 = vmatprep.mubr.f32.mxu0 %v2887_v4 }
  0x18   :  { %781 = vmatprep.mubr.f32.mxu1 %v2887_v4 }
  0xce   :  { %v148_v22 = vpop.f32.mrf.mxu0 }
  0xcf   :  { %v230_v23 = vpop.f32.mrf.mxu1 }
  0xd0   :  { %v150_v24 = vpop.f32.mrf.mxu0  ;;  %v231_v25 = vadd.f32 %v230_v23, %v148_v22  ;;  %v675_v22 = vsub.f32 %v599_v17, %v2962_v19  ;;  %v2969_v23 = vand.u32 4294901760, %v602_v20 }
  0xd1   :  { %v232_v26 = vpop.f32.mrf.mxu1 }
  0xd2   :  { %v233_v27 = vadd.f32 %v232_v26, %v150_v24  ;;  %v307_v28 = vpop.f32.mrf.mxu0  ;;  %v605_v24 = vsel %vm597_vm2, %v596_v21, 0  ;;  %v676_v26 = vand.u32 4294901760, %v675_v22 }
  0xd3   :  { %v308_v29 = vadd.f32 %v307_v28, %v231_v25  ;;  %v383_v30 = vpop.f32.mrf.mxu1  ;;  %v2973_v28 = vand.u32 4294901760, %v605_v24 }
  0xd4   :  { %v309_v31 = vpop.f32.mrf.mxu0 }
  0xd5   :  { %v310_v32 = vadd.f32 %v309_v31, %v233_v27  ;;  %v384_v33 = vadd.f32 %v383_v30, %v308_v29  ;;  %v385_v34 = vpop.f32.mrf.mxu1  ;;  %v686_v27 = vsub.f32 %v602_v20, %v2969_v23 }
  0xd6   :  { %v461_v35 = vpop.f32.mrf.mxu0 }
  0xd7   :  { %v386_v36 = vadd.f32 %v385_v34, %v310_v32  ;;  %v462_v37 = vadd.f32 %v461_v35, %v384_v33  ;;  %v535_v38 = vpop.f32.mrf.mxu1  ;;  %v677_v34 = vsub.f32 %v675_v22, %v676_v26  ;;  %v687_v35 = vand.u32 4294901760, %v686_v27 }
  0xd8   :  { %v463_v39 = vpop.f32.mrf.mxu0 }
  0xd9   :  { %v464_v40 = vadd.f32 %v463_v39, %v386_v36  ;;  %v537_v41 = vpop.f32.mrf.mxu1  ;;  %v536_v42 = vadd.f32 %v535_v38, %v462_v37  ;;  %v697_v36 = vsub.f32 %v605_v24, %v2973_v28 }
  0xdb   :  { %v538_v43 = vadd.f32 %v537_v41, %v464_v40  ;;  %v541_v46 = vmul.f32 %v536_v42, %v536_v42  ;;  %v678_v41 = vand.u32 4294901760, %v677_v34 }
  0xdd   :  { %v543_v44 = vadd.f32 %v538_v43, %v536_v42  ;;  %v542_v45 = vmul.f32 %v538_v43, %v538_v43 }
  0xdf   :  { %544 = vadd.xlane.f32.xlu0 %v543_v44  ;;  %v546_v47 = vadd.f32 %v542_v45, %v541_v46 }
  0xe3   :  { %547 = vadd.xlane.f32.xlu0 %v546_v47 }
 0x168   :  { %v545_v49 = vpop.xlane.xlu0 %544 }
 0x169   :  { %v549_v50 = vmul.f32 0.00390625, %v545_v49 }
 0x16b   :  { %v551_v52 = vmul.f32 %v549_v50, %v549_v50 }
 0x16c   :  { %v548_v51 = vpop.xlane.xlu0 %547 }
 0x16d   :  { %v550_v53 = vmul.f32 0.00390625, %v548_v51 }
 0x16f   :  { %v552_v54 = vsub.f32 %v550_v53, %v551_v52 }
 0x171   :  { %v553_v55 = vadd.f32 1e-05, %v552_v54 }
 0x173   :  { %2829 = vrsqrt.f32 %v553_v55 }
 0x180   :  { %v2830_v58 = vpop.eup %2829 }
 0x181   :  { %v555_v59 = vmul.f32 %v2830_v58, %v2949_v57 }
 0x183   :  { %v556_v60 = vmul.f32 %v555_v59, %v549_v50 }
 0x185   :  { %558 = vrot.lane.b32.xlu1 %v556_v60, %s2890_s25 }
 0x189   :  { %564 = vperm.xlu1 %2818, %v555_v59  }
 0x1f7   :  { %v559_v61 = vpop.permute.xlu1 %558 }
 0x1f8   :  { %v561_v62 = vsub.f32 %v2949_v57, %v559_v61 }
 0x1fa   :  { %571 = vperm.xlu0 %2819, %v561_v62  }
 0x1fe   :  { %2822 = vset.pattern.permute.xlu0 %v2888_v48 }
 0x204   :  { %v565_v63 = vpop.permute.xlu1 %564 }
 0x205   :  { %v567_v0 = vmul.f32 %v565_v63, %v536_v42  ;;  %v568_v1 = vmul.f32 %v565_v63, %v538_v43  ;;  %v688_v42 = vsub.f32 %v686_v27, %v687_v35  ;;  %v698_v43 = vand.u32 4294901760, %v697_v36 }
 0x207   :  { %v689_v49 = vand.u32 4294901760, %v688_v42  ;;  %v699_v50 = vsub.f32 %v697_v36, %v698_v43 }
 0x209   :  { %v700_v55 = vand.u32 4294901760, %v699_v50 }
 0x275   :  { %v572_v2 = vpop.permute.xlu0 %571 }
 0x276   :  { %v574_v3 = vadd.f32 %v572_v2, %v567_v0  ;;  %v575_v5 = vadd.f32 %v572_v2, %v568_v1 }
 0x278   :  { %v576_v6 = vmul.f32 %v574_v3, %v574_v3  ;;  %v577_v7 = vmul.f32 %v575_v5, %v575_v5 }
 0x27a   :  { %v578_v8 = vmul.f32 %v576_v6, %v574_v3  ;;  %v579_v9 = vmul.f32 %v577_v7, %v575_v5 }
 0x27c   :  { %v580_v10 = vmul.f32 0.044715, %v578_v8  ;;  %v581_v11 = vmul.f32 0.044715, %v579_v9 }
 0x27e   :  { %v582_v12 = vadd.f32 %v580_v10, %v574_v3  ;;  %v583_v13 = vadd.f32 %v581_v11, %v575_v5 }
 0x280   :  { %v584_v14 = vmul.f32 0.7978846, %v582_v12  ;;  %v585_v15 = vmul.f32 0.7978846, %v583_v13 }
 0x282   :  { %2831 = vtanh.f32 %v584_v14 }
 0x283   :  { %2833 = vtanh.f32 %v585_v15 }
 0x28f   :  { %v2832_v25 = vpop.eup %2831 }
 0x290   :  { %v2834_v29 = vpop.eup %2833  ;;  %v588_v30 = vadd.f32 1.0, %v2832_v25 }
 0x291   :  { %v589_v31 = vadd.f32 1.0, %v2834_v29 }
 0x292   :  { %v590_v32 = vmul.f32 0.5, %v588_v30 }
 0x293   :  { %v591_v33 = vmul.f32 0.5, %v589_v31 }
 0x294   :  { %v592_v37 = vmul.f32 %v590_v32, %v574_v3 }
 0x295   :  { %v593_v38 = vmul.f32 %v591_v33, %v575_v5 }
 0x296   :  { %v639_v39 = vand.u32 4294901760, %v592_v37 }
 0x297   :  { %v637_v40 = vand.u32 4294901760, %v593_v38 }
 0x298   :  { %v744_v44 = vsub.f32 %v592_v37, %v639_v39 }
 0x299   :  { %638 = vmatprep.subr.mxu0 %v637_v40  ;;  %v738_v45 = vsub.f32 %v593_v38, %v637_v40 }
 0x29a   :  { %640 = vmatpush1.msra.mxu0 %v639_v39  ;;  %v745_v46 = vand.u32 4294901760, %v744_v44 }
 0x29b   :  { %679 = vmatmul.mubr.f32.vlgmr.msra.gmra.mxu0 %v678_v41  ;;  %835 = vmatprep.subr.mxu0 %v738_v45  ;;  %v739_v47 = vand.u32 4294901760, %v738_v45 }
 0x29c   :  { %838 = vmatpush1.msra.mxu0 %v744_v44  ;;  %684 = vmatprep.mubr.f32.mxu0 %v2887_v4  ;;  %v746_v51 = vsub.f32 %v744_v44, %v745_v46 }
 0x29d   :  { %1023 = vmatprep.subr.mxu0 %v739_v47  ;;  %v740_v52 = vsub.f32 %v738_v45, %v739_v47 }
 0x29e   :  { %v747_v53 = vand.u32 4294901760, %v746_v51 }
 0x29f   :  { %690 = vmatmul.mubr.f32.gmra.mxu0 %v689_v49  ;;  %v741_v54 = vand.u32 4294901760, %v740_v52 }
 0x2a0   :  { %695 = vmatprep.mubr.f32.mxu0 %v2887_v4 }
 0x2a1   :  { %742 = vmatprep.subr.mxu1 %v741_v54 }
 0x2a2   :  { %748 = vmatpush1.msra.mxu1 %v747_v53 }
 0x2a3   :  { %701 = vmatmul.mubr.f32.gmra.mxu0 %v700_v55  ;;  %783 = vmatmul.mubr.f32.vlgmr.msra.gmra.mxu1 %v2962_v19 }
 0x2a4   :  { %927 = vmatprep.subr.mxu1 %v637_v40  ;;  %788 = vmatprep.mubr.f32.mxu1 %v2887_v4 }
 0x2a5   :  { %929 = vmatpush1.msra.mxu1 %v639_v39  ;;  %871 = vmatprep.mubr.f32.mxu0 %v2887_v4 }
 0x2a6   :  { %1113 = vmatprep.subr.mxu1 %v637_v40 }
 0x2a7   :  { %790 = vmatmul.mubr.f32.gmra.mxu1 %v2969_v23  ;;  %874 = vmatmul.mubr.f32.vlgmr.msra.gmra.mxu0 %v675_v22 }
 0x2a8   :  { %1027 = vmatpush1.msra.mxu0 %v745_v46  ;;  %795 = vmatprep.mubr.f32.mxu1 %v2887_v4 }
 0x2a9   :  { %879 = vmatprep.mubr.f32.mxu0 %v2887_v4 }
 0x2ab   :  { %797 = vmatmul.mubr.f32.gmra.mxu1 %v2973_v28  ;;  %882 = vmatmul.mubr.f32.gmra.mxu0 %v686_v27 }
 0x2ac   :  { %887 = vmatprep.mubr.f32.mxu0 %v2887_v4  ;;  %962 = vmatprep.mubr.f32.mxu1 %v2887_v4 }
 0x2af   :  { %890 = vmatmul.mubr.f32.gmra.mxu0 %v697_v36  ;;  %966 = vmatmul.mubr.f32.vlgmr.msra.gmra.mxu1 %v676_v26 }
 0x2b0   :  { %1115 = vmatpush1.msra.mxu1 %v639_v39  ;;  %971 = vmatprep.mubr.f32.mxu1 %v2887_v4 }
 0x2b1   :  { %1060 = vmatprep.mubr.f32.mxu0 %v2887_v4 }
 0x2b3   :  { %975 = vmatmul.mubr.f32.gmra.mxu1 %v687_v35  ;;  %1062 = vmatmul.mubr.f32.vlgmr.msra.gmra.mxu0 %v2962_v19 }
 0x2b4   :  { %980 = vmatprep.mubr.f32.mxu1 %v2887_v4  ;;  %1067 = vmatprep.mubr.f32.mxu0 %v2887_v4 }
 0x2b7   :  { %984 = vmatmul.mubr.f32.gmra.mxu1 %v698_v43  ;;  %1069 = vmatmul.mubr.f32.gmra.mxu0 %v2969_v23 }
 0x2b8   :  { %1074 = vmatprep.mubr.f32.mxu0 %v2887_v4  ;;  %1148 = vmatprep.mubr.f32.mxu1 %v2887_v4 }
 0x2bb   :  { %1076 = vmatmul.mubr.f32.gmra.mxu0 %v2973_v28  ;;  %1150 = vmatmul.mubr.f32.vlgmr.msra.gmra.mxu1 %v2962_v19 }
 0x2bc   :  { %1155 = vmatprep.mubr.f32.mxu1 %v2887_v4  ;;  %1319 = vmatprep.mubr.f32.mxu0 %v2887_v4 }
 0x2bf   :  { %1157 = vmatmul.mubr.f32.gmra.mxu1 %v2969_v23 }
 0x2c0   :  { %1162 = vmatprep.mubr.f32.mxu1 %v2887_v4 }
 0x2c3   :  { %1164 = vmatmul.mubr.f32.gmra.mxu1 %v2973_v28 }
 0x2c4   :  { %1416 = vmatprep.mubr.f32.mxu1 %v2887_v4 }
 0x35b   :  { %v680_v58 = vpop.f32.mrf.mxu0 }
 0x35d   :  { %v682_v59 = vpop.f32.mrf.mxu0 }
 0x35f   :  { %v691_v60 = vpop.f32.mrf.mxu0 }
 0x361   :  { %v693_v61 = vpop.f32.mrf.mxu0 }
 0x363   :  { %v702_v62 = vpop.f32.mrf.mxu0  ;;  %v784_v63 = vpop.f32.mrf.mxu1 }
 0x364   :  { %v785_v21 = vadd.f32 %v784_v63, %v680_v58 }
 0x365   :  { %v704_v0 = vpop.f32.mrf.mxu0  ;;  %v786_v1 = vpop.f32.mrf.mxu1 }
 0x366   :  { %v787_v29 = vadd.f32 %v786_v1, %v682_v59 }
 0x367   :  { %v791_v2 = vpop.f32.mrf.mxu1  ;;  %v875_v3 = vpop.f32.mrf.mxu0 }
 0x368   :  { %v792_v5 = vadd.f32 %v791_v2, %v691_v60  ;;  %v876_v25 = vadd.f32 %v875_v3, %v785_v21 }
 0x369   :  { %v793_v6 = vpop.f32.mrf.mxu1  ;;  %v877_v7 = vpop.f32.mrf.mxu0 }
 0x36a   :  { %v794_v8 = vadd.f32 %v793_v6, %v693_v61  ;;  %v878_v34 = vadd.f32 %v877_v7, %v787_v29  ;;  %v2892_v29 = vmov 2  }
 0x36b   :  { %v798_v9 = vpop.f32.mrf.mxu1  ;;  %v883_v10 = vpop.f32.mrf.mxu0  ;;  %2820 = vset.pattern.permute.xlu1 %v2892_v29 }
 0x36c   :  { %v884_v11 = vadd.f32 %v883_v10, %v792_v5  ;;  %v799_v38 = vadd.f32 %v798_v9, %v702_v62 }
 0x36d   :  { %v800_v12 = vpop.f32.mrf.mxu1  ;;  %v885_v13 = vpop.f32.mrf.mxu0 }
 0x36e   :  { %v886_v14 = vadd.f32 %v885_v13, %v794_v8  ;;  %v801_v46 = vadd.f32 %v800_v12, %v704_v0  ;;  %v24_v0 = vlaneseq }
 0x36f   :  { %v891_v15 = vpop.f32.mrf.mxu0  ;;  %v967_v16 = vpop.f32.mrf.mxu1 }
 0x370   :  { %v968_v30 = vadd.f32 %v967_v16, %v876_v25  ;;  %v892_v42 = vadd.f32 %v891_v15, %v799_v38  ;;  %v3007_v1 = vand.u32 127, %v24_v0 }
 0x371   :  { %v893_v17 = vpop.f32.mrf.mxu0  ;;  %v969_v18 = vpop.f32.mrf.mxu1 }
 0x372   :  { %v970_v39 = vadd.f32 %v969_v18, %v878_v34  ;;  %v894_v52 = vadd.f32 %v893_v17, %v801_v46  ;;  %v26_v2 = vadd.s32 128, %v3007_v1  ;;  %vm51_vm3 = vcmp.ne.s32.totalorder %v3007_v1, 0 }
 0x373   :  { %v976_v19 = vpop.f32.mrf.mxu1  ;;  %v1063_v20 = vpop.f32.mrf.mxu0  ;;  %vm1174_vm5 = vcmp.lt.s32.totalorder %v3007_v1, 1  ;;  %v3013_v7 = vsel %vm51_vm3, 1.0, %v2887_v4  ;;  %vm57_vm6 = vcmp.ne.s32.totalorder %v3007_v1, 127  ;;  %vm1185_vm8 = vcmp.lt.s32.totalorder %v3007_v1, 127 }
 0x374   :  { %v977_v22 = vadd.f32 %v976_v19, %v884_v11  ;;  %v1064_v35 = vadd.f32 %v1063_v20, %v968_v30  ;;  %v38_v5 = vand.u32 127, %v26_v2 }
 0x375   :  { %v978_v23 = vpop.f32.mrf.mxu1  ;;  %v1065_v24 = vpop.f32.mrf.mxu0 }
 0x376   :  { %v979_v26 = vadd.f32 %v978_v23, %v886_v14  ;;  %v1066_v43 = vadd.f32 %v1065_v24, %v970_v39  ;;  %vm52_vm4 = vcmp.ne.s32.totalorder %v38_v5, 0  ;;  %vm58_vm7 = vcmp.ne.s32.totalorder %v38_v5, 127 }
 0x377   :  { %v985_v27 = vpop.f32.mrf.mxu1  ;;  %v1070_v28 = vpop.f32.mrf.mxu0  ;;  %v3016_v8 = vsel %vm52_vm4, 1.0, %v2887_v4  ;;  %v3027_v14 = vsel %vm57_vm6, 1.0, %v2887_v4  ;;  %v3030_v15 = vsel %vm58_vm7, 1.0, %v2887_v4 }
 0x378   :  { %v1071_v31 = vadd.f32 %v1070_v28, %v977_v22  ;;  %v986_v47 = vadd.f32 %v985_v27, %v892_v42 }
 0x379   :  { %v987_v32 = vpop.f32.mrf.mxu1  ;;  %v1072_v33 = vpop.f32.mrf.mxu0 }
 0x37a   :  { %v1073_v36 = vadd.f32 %v1072_v33, %v979_v26  ;;  %v988_v59 = vadd.f32 %v987_v32, %v894_v52 }
 0x37b   :  { %v1151_v37 = vpop.f32.mrf.mxu1  ;;  %v1077_v44 = vpop.f32.mrf.mxu0 }
 0x37c   :  { %v1152_v40 = vadd.f32 %v1151_v37, %v1064_v35  ;;  %v1078_v53 = vadd.f32 %v1077_v44, %v986_v47 }
 0x37d   :  { %v1153_v41 = vpop.f32.mrf.mxu1  ;;  %v1079_v55 = vpop.f32.mrf.mxu0 }
 0x37e   :  { %1170 = vrot.lane.b32.xlu1 %v1152_v40, %s2890_s25  ;;  %v1154_v49 = vadd.f32 %v1153_v41, %v1066_v43  ;;  %v1080_v62 = vadd.f32 %v1079_v55, %v988_v59  ;;  %v2893_v40 = vmov 3  }
 0x37f   :  { %v1158_v45 = vpop.f32.mrf.mxu1 }
 0x380   :  { %v1159_v50 = vadd.f32 %v1158_v45, %v1071_v31 }
 0x381   :  { %v1160_v51 = vpop.f32.mrf.mxu1 }
 0x382   :  { %v1161_v54 = vadd.f32 %v1160_v51, %v1073_v36  ;;  %1172 = vrot.lane.b32.xlu1 %v1154_v49, %s2890_s25 }
 0x383   :  { %v1165_v58 = vpop.f32.mrf.mxu1 }
 0x384   :  { %v1166_v60 = vadd.f32 %v1165_v58, %v1078_v53 }
 0x385   :  { %v1167_v61 = vpop.f32.mrf.mxu1 }
 0x386   :  { %1181 = vrot.lane.b32.xlu1 %v1166_v60, %s2891_s1  ;;  %v1168_v63 = vadd.f32 %v1167_v61, %v1080_v62  ;;  %v1246_v62 = vld [vmem:[%s3367_s3 + $0x8] sm:$0xff] }
 0x387   :  { %v1251_v0 = vsel %vm597_vm2, %v1246_v62, 0 }
 0x38a   :  { %1183 = vrot.lane.b32.xlu1 %v1168_v63, %s2891_s1 }
 0x3f0   :  { %v1171_v3 = vpop.permute.xlu1 %1170 }
 0x3f4   :  { %v1173_v6 = vpop.permute.xlu1 %1172 }
 0x3f5   :  { %v1175_v9 = vsel %vm1174_vm5, %v1171_v3, %v1173_v6  ;;  %v1176_v10 = vsel %vm1174_vm5, %v1173_v6, %v1171_v3  ;;  %v1331_v3 = vand.u32 4294901760, %v1251_v0 }
 0x3f6   :  { %v1177_v12 = vmul.f32 %v3013_v7, %v1176_v10  ;;  %v1178_v13 = vmul.f32 %v3016_v8, %v1175_v9 }
 0x3f7   :  { %v1332_v9 = vsub.f32 %v1251_v0, %v1331_v3 }
 0x3f8   :  { %v1182_v11 = vpop.permute.xlu1 %1181  ;;  %v1179_v19 = vadd.f32 %v1177_v12, %v1159_v50  ;;  %v1180_v20 = vadd.f32 %v1178_v13, %v1161_v54 }
 0x3fc   :  { %v1184_v16 = vpop.permute.xlu1 %1183 }
 0x3fd   :  { %v1186_v17 = vsel %vm1185_vm8, %v1182_v11, %v1184_v16  ;;  %v1187_v18 = vsel %vm1185_vm8, %v1184_v16, %v1182_v11 }
 0x3fe   :  { %v1188_v21 = vmul.f32 %v3027_v14, %v1186_v17  ;;  %v1189_v22 = vmul.f32 %v3030_v15, %v1187_v18  ;;  %v1333_v18 = vand.u32 4294901760, %v1332_v9 }
 0x400   :  { %v1190_v23 = vadd.f32 %v1188_v21, %v1179_v19  ;;  %v1191_v24 = vadd.f32 %v1189_v22, %v1180_v20 }
 0x402   :  { %v1194_v25 = vadd.f32 %v1191_v24, %v1190_v23  ;;  %v1192_v26 = vmul.f32 %v1190_v23, %v1190_v23  ;;  %v1193_v27 = vmul.f32 %v1191_v24, %v1191_v24 }
 0x404   :  { %1195 = vadd.xlane.f32.xlu1 %v1194_v25  ;;  %v1197_v28 = vadd.f32 %v1193_v27, %v1192_v26 }
 0x406   :  { %1198 = vadd.xlane.f32.xlu0 %v1197_v28 }
 0x48d   :  { %v1196_v30 = vpop.xlane.xlu1 %1195 }
 0x48e   :  { %v1200_v31 = vmul.f32 0.00390625, %v1196_v30 }
 0x48f   :  { %v1199_v32 = vpop.xlane.xlu0 %1198 }
 0x490   :  { %v1202_v33 = vmul.f32 %v1200_v31, %v1200_v31  ;;  %v1201_v34 = vmul.f32 0.00390625, %v1199_v32 }
 0x492   :  { %v1203_v35 = vsub.f32 %v1201_v34, %v1202_v33 }
 0x494   :  { %v1204_v36 = vadd.f32 1e-05, %v1203_v35 }
 0x496   :  { %2835 = vrsqrt.f32 %v1204_v36 }
 0x4a3   :  { %v2836_v37 = vpop.eup %2835 }
 0x4a4   :  { %v1206_v38 = vmul.f32 %v2836_v37, %v2949_v57 }
 0x4a6   :  { %v1207_v39 = vmul.f32 %v1206_v38, %v1200_v31 }
 0x4a8   :  { %1209 = vrot.lane.b32.xlu1 %v1207_v39, %s2890_s25 }
 0x4ac   :  { %1215 = vperm.xlu1 %2820, %v1206_v38  }
 0x4b0   :  { %2821 = vset.pattern.permute.xlu1 %v2893_v40 }
 0x51a   :  { %v1210_v41 = vpop.permute.xlu1 %1209 }
 0x51b   :  { %v1212_v42 = vsub.f32 %v2949_v57, %v1210_v41 }
 0x51d   :  { %1222 = vperm.xlu1 %2821, %v1212_v42  }
 0x521   :  { %2823 = vset.pattern.permute.xlu1 %v2888_v48  ;;  %v1245_v48 = vld [vmem:[%s3367_s3] sm:$0xff] }
 0x522   :  { %v1248_v57 = vsel %vm597_vm2, %v1245_v48, 0 }
 0x523   :  { %v1320_v63 = vand.u32 4294901760, %v1248_v57 }
 0x525   :  { %v1321_v2 = vsub.f32 %v1248_v57, %v1320_v63 }
 0x527   :  { %v1216_v43 = vpop.permute.xlu1 %1215  ;;  %v1322_v6 = vand.u32 4294901760, %v1321_v2 }
 0x528   :  { %v1218_v44 = vmul.f32 %v1216_v43, %v1190_v23  ;;  %v1219_v45 = vmul.f32 %v1216_v43, %v1191_v24  ;;  %v1334_v24 = vsub.f32 %v1332_v9, %v1333_v18 }
 0x529   :  { %v1323_v17 = vsub.f32 %v1321_v2, %v1322_v6 }
 0x52a   :  { %v1335_v30 = vand.u32 4294901760, %v1334_v24 }
 0x52b   :  { %v1324_v23 = vand.u32 4294901760, %v1323_v17 }
 0x598   :  { %v1223_v46 = vpop.permute.xlu1 %1222 }
 0x599   :  { %v1225_v47 = vadd.f32 %v1223_v46, %v1218_v44  ;;  %v1226_v49 = vadd.f32 %v1223_v46, %v1219_v45 }
 0x59b   :  { %v1227_v50 = vmul.f32 %v1225_v47, %v1225_v47  ;;  %v1228_v51 = vmul.f32 %v1226_v49, %v1226_v49 }
 0x59d   :  { %v1229_v52 = vmul.f32 %v1227_v50, %v1225_v47  ;;  %v1230_v53 = vmul.f32 %v1228_v51, %v1226_v49 }
 0x59f   :  { %v1231_v54 = vmul.f32 0.044715, %v1229_v52  ;;  %v1232_v55 = vmul.f32 0.044715, %v1230_v53 }
 0x5a1   :  { %v1233_v58 = vadd.f32 %v1231_v54, %v1225_v47  ;;  %v1234_v59 = vadd.f32 %v1232_v55, %v1226_v49 }
 0x5a3   :  { %v1235_v60 = vmul.f32 0.7978846, %v1233_v58  ;;  %v1236_v61 = vmul.f32 0.7978846, %v1234_v59 }
 0x5a5   :  { %2837 = vtanh.f32 %v1235_v60 }
 0x5a6   :  { %2839 = vtanh.f32 %v1236_v61 }
 0x5b2   :  { %v2838_v5 = vpop.eup %2837 }
 0x5b3   :  { %v2840_v10 = vpop.eup %2839  ;;  %v1239_v11 = vadd.f32 1.0, %v2838_v5 }
 0x5b4   :  { %v1240_v12 = vadd.f32 1.0, %v2840_v10 }
 0x5b5   :  { %v1241_v13 = vmul.f32 0.5, %v1239_v11 }
 0x5b6   :  { %v1242_v16 = vmul.f32 0.5, %v1240_v12 }
 0x5b7   :  { %v1243_v19 = vmul.f32 %v1241_v13, %v1225_v47 }
 0x5b8   :  { %v1244_v20 = vmul.f32 %v1242_v16, %v1226_v49 }
 0x5b9   :  { %v1285_v21 = vand.u32 4294901760, %v1243_v19 }
 0x5ba   :  { %v1283_v22 = vand.u32 4294901760, %v1244_v20 }
 0x5bb   :  { %v1379_v25 = vsub.f32 %v1243_v19, %v1285_v21 }
 0x5bc   :  { %1284 = vmatprep.subr.mxu0 %v1283_v22  ;;  %v1373_v26 = vsub.f32 %v1244_v20, %v1283_v22 }
 0x5bd   :  { %1286 = vmatpush1.msra.mxu0 %v1285_v21  ;;  %v1380_v27 = vand.u32 4294901760, %v1379_v25 }
 0x5be   :  { %1325 = vmatmul.mubr.f32.vlgmr.msra.gmra.mxu0 %v1324_v23  ;;  %1463 = vmatprep.subr.mxu0 %v1373_v26  ;;  %v1374_v28 = vand.u32 4294901760, %v1373_v26 }
 0x5bf   :  { %1466 = vmatpush1.msra.mxu0 %v1379_v25  ;;  %1330 = vmatprep.mubr.f32.mxu0 %v2887_v4  ;;  %v1381_v31 = vsub.f32 %v1379_v25, %v1380_v27 }
 0x5c0   :  { %1634 = vmatprep.subr.mxu0 %v1374_v28  ;;  %v1375_v32 = vsub.f32 %v1373_v26, %v1374_v28 }
 0x5c1   :  { %v1382_v33 = vand.u32 4294901760, %v1381_v31 }
 0x5c2   :  { %1336 = vmatmul.mubr.f32.gmra.mxu0 %v1335_v30  ;;  %v1376_v34 = vand.u32 4294901760, %v1375_v32 }
 0x5c3   :  { %1499 = vmatprep.mubr.f32.mxu0 %v2887_v4 }
 0x5c4   :  { %1377 = vmatprep.subr.mxu1 %v1376_v34 }
 0x5c5   :  { %1383 = vmatpush1.msra.mxu1 %v1382_v33 }
 0x5c6   :  { %1418 = vmatmul.mubr.f32.vlgmr.msra.gmra.mxu1 %v1320_v63  ;;  %1502 = vmatmul.mubr.f32.vlgmr.msra.gmra.mxu0 %v1321_v2 }
 0x5c7   :  { %1547 = vmatprep.subr.mxu1 %v1283_v22  ;;  %1638 = vmatpush1.msra.mxu0 %v1380_v27 }
 0x5c8   :  { %1549 = vmatpush1.msra.mxu1 %v1285_v21  ;;  %1423 = vmatprep.mubr.f32.mxu1 %v2887_v4 }
 0x5c9   :  { %1717 = vmatprep.subr.mxu1 %v1283_v22  ;;  %1507 = vmatprep.mubr.f32.mxu0 %v2887_v4 }
 0x5ca   :  { %1425 = vmatmul.mubr.f32.gmra.mxu1 %v1331_v3  ;;  %1510 = vmatmul.mubr.f32.gmra.mxu0 %v1332_v9 }
 0x5cb   :  { %1582 = vmatprep.mubr.f32.mxu1 %v2887_v4  ;;  %1671 = vmatprep.mubr.f32.mxu0 %v2887_v4 }
 0x5ce   :  { %1586 = vmatmul.mubr.f32.vlgmr.msra.gmra.mxu1 %v1322_v6  ;;  %1673 = vmatmul.mubr.f32.vlgmr.msra.gmra.mxu0 %v1320_v63 }
 0x5cf   :  { %1719 = vmatpush1.msra.mxu1 %v1285_v21  ;;  %1591 = vmatprep.mubr.f32.mxu1 %v2887_v4 }
 0x5d0   :  { %1678 = vmatprep.mubr.f32.mxu0 %v2887_v4 }
 0x5d2   :  { %1595 = vmatmul.mubr.f32.gmra.mxu1 %v1333_v18  ;;  %1680 = vmatmul.mubr.f32.gmra.mxu0 %v1331_v3 }
 0x5d3   :  { %1752 = vmatprep.mubr.f32.mxu1 %v2887_v4  ;;  %1968 = vmatprep.mubr.f32.mxu0 %v2887_v4 }
 0x5d6   :  { %1754 = vmatmul.mubr.f32.vlgmr.msra.gmra.mxu1 %v1320_v63 }
 0x5d7   :  { %1759 = vmatprep.mubr.f32.mxu1 %v2887_v4 }
 0x5da   :  { %1761 = vmatmul.mubr.f32.gmra.mxu1 %v1331_v3 }
 0x5db   :  { %2119 = vmatprep.mubr.f32.mxu1 %v2887_v4 }
 0x67e   :  { %v1326_v35 = vpop.f32.mrf.mxu0 }
 0x680   :  { %v1328_v36 = vpop.f32.mrf.mxu0 }
 0x682   :  { %v1337_v37 = vpop.f32.mrf.mxu0 }
 0x684   :  { %v1339_v38 = vpop.f32.mrf.mxu0 }
 0x686   :  { %v1419_v39 = vpop.f32.mrf.mxu1  ;;  %v1503_v41 = vpop.f32.mrf.mxu0 }
 0x687   :  { %v1420_v49 = vadd.f32 %v1419_v39, %v1326_v35 }
 0x688   :  { %v1421_v42 = vpop.f32.mrf.mxu1  ;;  %v1505_v43 = vpop.f32.mrf.mxu0 }
 0x689   :  { %v1422_v50 = vadd.f32 %v1421_v42, %v1328_v36  ;;  %v1504_v55 = vadd.f32 %v1503_v41, %v1420_v49 }
 0x68a   :  { %v1426_v44 = vpop.f32.mrf.mxu1  ;;  %v1511_v45 = vpop.f32.mrf.mxu0 }
 0x68b   :  { %v1427_v58 = vadd.f32 %v1426_v44, %v1337_v37  ;;  %v1506_v59 = vadd.f32 %v1505_v43, %v1422_v50 }
 0x68c   :  { %v1428_v46 = vpop.f32.mrf.mxu1  ;;  %v1513_v47 = vpop.f32.mrf.mxu0 }
 0x68d   :  { %v1429_v60 = vadd.f32 %v1428_v46, %v1339_v38  ;;  %v1512_v0 = vadd.f32 %v1511_v45, %v1427_v58 }
 0x68e   :  { %v1587_v51 = vpop.f32.mrf.mxu1  ;;  %v1674_v52 = vpop.f32.mrf.mxu0 }
 0x68f   :  { %v1588_v48 = vadd.f32 %v1587_v51, %v1504_v55  ;;  %v1514_v2 = vadd.f32 %v1513_v47, %v1429_v60  ;;  %v3077_v47 = vld [vmem:[%s3368_s4 + $0x8] sm:$0xff]  ;;  %v3083_v51 = vld [vmem:[%s3368_s4] sm:$0xff] }
 0x690   :  { %v1589_v53 = vpop.f32.mrf.mxu1  ;;  %v1676_v54 = vpop.f32.mrf.mxu0 }
 0x691   :  { %v1590_v57 = vadd.f32 %v1589_v53, %v1506_v59  ;;  %v1675_v5 = vadd.f32 %v1674_v52, %v1588_v48 }
 0x692   :  { %v1596_v61 = vpop.f32.mrf.mxu1  ;;  %v1681_v63 = vpop.f32.mrf.mxu0 }
 0x693   :  { %v1597_v6 = vadd.f32 %v1596_v61, %v1512_v0  ;;  %v1677_v9 = vadd.f32 %v1676_v54, %v1590_v57 }
 0x694   :  { %v1598_v62 = vpop.f32.mrf.mxu1  ;;  %v1683_v11 = vpop.f32.mrf.mxu0 }
 0x695   :  { %v1599_v10 = vadd.f32 %v1598_v62, %v1514_v2  ;;  %v1682_v18 = vadd.f32 %v1681_v63, %v1597_v6 }
 0x696   :  { %v1755_v3 = vpop.f32.mrf.mxu1 }
 0x697   :  { %v3064_v13 = vadd.f32 %v1755_v3, %v1675_v5  ;;  %v1684_v19 = vadd.f32 %v1683_v11, %v1599_v10 }
 0x698   :  { %v1757_v12 = vpop.f32.mrf.mxu1 }
 0x699   :  { %v3066_v16 = vadd.f32 %v1757_v12, %v1677_v9  ;;  %v1769_v30 = vmul.f32 %v3064_v13, %v3064_v13 }
 0x69a   :  { %v1762_v17 = vpop.f32.mrf.mxu1 }
 0x69b   :  { %v1773_v20 = vadd.f32 %v3066_v16, %v3064_v13  ;;  %v1763_v22 = vadd.f32 %v1762_v17, %v1682_v18  ;;  %v1770_v28 = vmul.f32 %v3066_v16, %v3066_v16 }
 0x69c   :  { %v1764_v21 = vpop.f32.mrf.mxu1 }
 0x69d   :  { %v1765_v23 = vadd.f32 %v1764_v21, %v1684_v19  ;;  %1774 = vadd.xlane.f32.xlu1 %v1773_v20  ;;  %v1771_v26 = vmul.f32 %v1763_v22, %v1763_v22  ;;  %v1779_v31 = vadd.f32 %v1770_v28, %v1769_v30 }
 0x69f   :  { %v1776_v24 = vadd.f32 %v1765_v23, %v1763_v22  ;;  %v1772_v25 = vmul.f32 %v1765_v23, %v1765_v23 }
 0x6a1   :  { %1777 = vadd.xlane.f32.xlu0 %v1776_v24  ;;  %v1782_v27 = vadd.f32 %v1772_v25, %v1771_v26 }
 0x6a5   :  { %1783 = vadd.xlane.f32.xlu0 %v1782_v27 }
 0x6a9   :  { %1780 = vadd.xlane.f32.xlu0 %v1779_v31 }
 0x726   :  { %v1775_v34 = vpop.xlane.xlu1 %1774 }
 0x727   :  { %v1785_v36 = vmul.f32 0.00390625, %v1775_v34  ;;  %v1876_v34 = vld [vmem:[%s3367_s3 + $0x18] sm:$0xff] }
 0x729   :  { %v1789_v42 = vmul.f32 %v1785_v36, %v1785_v36 }
 0x72a   :  { %v1778_v32 = vpop.xlane.xlu0 %1777 }
 0x72b   :  { %v1786_v33 = vmul.f32 0.00390625, %v1778_v32 }
 0x72d   :  { %v1790_v37 = vmul.f32 %v1786_v33, %v1786_v33 }
 0x72e   :  { %v1784_v35 = vpop.xlane.xlu0 %1783 }
 0x72f   :  { %v1788_v38 = vmul.f32 0.00390625, %v1784_v35 }
 0x731   :  { %v1792_v39 = vsub.f32 %v1788_v38, %v1790_v37  ;;  %v1877_v38 = vld [vmem:[%s3367_s3 + $0x20] sm:$0xff] }
 0x732   :  { %v1781_v41 = vpop.xlane.xlu0 %1780 }
 0x733   :  { %v1794_v43 = vadd.f32 1e-05, %v1792_v39  ;;  %v1787_v44 = vmul.f32 0.00390625, %v1781_v41 }
 0x735   :  { %2841 = vrsqrt.f32 %v1794_v43  ;;  %v1791_v45 = vsub.f32 %v1787_v44, %v1789_v42  ;;  %v1889_v43 = vsel %vm1881_vm9, %v1877_v38, 0 }
 0x737   :  { %v1793_v46 = vadd.f32 1e-05, %v1791_v45 }
 0x739   :  { %2843 = vrsqrt.f32 %v1793_v46  ;;  %v1878_v46 = vld [vmem:[%s3367_s3 + $0x28] sm:$0xff] }
 0x742   :  { %v2842_v49 = vpop.eup %2841 }
 0x743   :  { %v1798_v50 = vmul.f32 %v2842_v49, %v3077_v47 }
 0x745   :  { %v1800_v52 = vmul.f32 %v1798_v50, %v1786_v33  ;;  %v1875_v33 = vld [vmem:[%s3367_s3 + $0x10] sm:$0xff] }
 0x746   :  { %v2844_v53 = vpop.eup %2843  ;;  %v1883_v35 = vsel %vm1881_vm9, %v1875_v33, 0 }
 0x747   :  { %1805 = vrot.lane.b32.xlu0 %v1800_v52, %s2890_s25  ;;  %v1797_v54 = vmul.f32 %v2844_v53, %v3083_v51  ;;  %v3103_v37 = vand.u32 4294901760, %v1883_v35  ;;  %v3120_v53 = vand.u32 4294901760, %v1889_v43 }
 0x749   :  { %1813 = vperm.xlu1 %2823, %v1797_v54   ;;  %v1799_v55 = vmul.f32 %v1797_v54, %v1785_v36  ;;  %v1886_v36 = vsel %vm1881_vm9, %v1876_v34, 0  ;;  %v3111_v42 = vsub.f32 %v1883_v35, %v3103_v37 }
 0x74a   :  { %v3108_v39 = vand.u32 4294901760, %v1886_v36 }
 0x74b   :  { %1803 = vrot.lane.b32.xlu0 %v1799_v55, %s2890_s25 }
 0x74d   :  { %2825 = vset.pattern.permute.xlu1 %v2892_v29 }
 0x74f   :  { %1818 = vperm.xlu0 %2822, %v1798_v50   ;;  %v3118_v50 = vsub.f32 %v1886_v36, %v3108_v39 }
 0x753   :  { %2824 = vset.pattern.permute.xlu0 %v2889_v56 }
 0x7b9   :  { %v1806_v58 = vpop.permute.xlu0 %1805 }
 0x7ba   :  { %v1810_v59 = vsub.f32 %v3077_v47, %v1806_v58  ;;  %v1971_v58 = vand.u32 4294901760, %v3111_v42 }
 0x7bc   :  { %1832 = vperm.xlu0 %2824, %v1810_v59   ;;  %v1892_v59 = vsel %vm1881_vm9, %v1878_v46, 0 }
 0x7bd   :  { %v1804_v60 = vpop.permute.xlu0 %1803 }
 0x7be   :  { %v1809_v61 = vsub.f32 %v3083_v51, %v1804_v60 }
 0x7c0   :  { %1827 = vperm.xlu0 %2824, %v1809_v61  }
 0x7c4   :  { %2826 = vset.pattern.permute.xlu0 %v2892_v29  ;;  %v1814_v63 = vpop.permute.xlu1 %1813 }
 0x7c5   :  { %v1821_v5 = vmul.f32 %v1814_v63, %v3064_v13  ;;  %v1822_v56 = vmul.f32 %v1814_v63, %v3066_v16  ;;  %v1982_v63 = vand.u32 4294901760, %v3118_v50 }
 0x7ca   :  { %v1819_v48 = vpop.permute.xlu0 %1818 }
 0x7cb   :  { %v1823_v57 = vmul.f32 %v1819_v48, %v1763_v22  ;;  %v1824_v62 = vmul.f32 %v1819_v48, %v1765_v23 }
 0x837   :  { %v1833_v0 = vpop.permute.xlu0 %1832 }
 0x838   :  { %v1837_v2 = vadd.f32 %v1833_v0, %v1823_v57  ;;  %v1838_v3 = vadd.f32 %v1833_v0, %v1824_v62  ;;  %v1879_v0 = vld [vmem:[%s3367_s3 + $0x30] sm:$0xff] }
 0x83a   :  { %v1841_v6 = vmul.f32 %v1837_v2, %v1837_v2  ;;  %v1842_v9 = vmul.f32 %v1838_v3, %v1838_v3 }
 0x83b   :  { %v1828_v10 = vpop.permute.xlu0 %1827 }
 0x83c   :  { %v1845_v11 = vmul.f32 %v1841_v6, %v1837_v2  ;;  %v1846_v12 = vmul.f32 %v1842_v9, %v1838_v3  ;;  %v1835_v17 = vadd.f32 %v1828_v10, %v1821_v5  ;;  %v1836_v18 = vadd.f32 %v1828_v10, %v1822_v56 }
 0x83d   :  { %v3131_v6 = vsub.f32 %v1889_v43, %v3120_v53  ;;  %v3133_v9 = vand.u32 4294901760, %v1892_v59 }
 0x83e   :  { %v1849_v19 = vmul.f32 0.044715, %v1845_v11  ;;  %v1850_v29 = vmul.f32 0.044715, %v1846_v12  ;;  %v1839_v20 = vmul.f32 %v1835_v17, %v1835_v17  ;;  %v1840_v21 = vmul.f32 %v1836_v18, %v1836_v18 }
 0x840   :  { %v1853_v22 = vadd.f32 %v1849_v19, %v1837_v2  ;;  %v1854_v23 = vadd.f32 %v1850_v29, %v1838_v3  ;;  %v1843_v24 = vmul.f32 %v1839_v20, %v1835_v17  ;;  %v1844_v25 = vmul.f32 %v1840_v21, %v1836_v18 }
 0x841   :  { %v1895_v19 = vsel %vm1881_vm9, %v1879_v0, 0  ;;  %v1983_v21 = vsub.f32 %v3118_v50, %v1982_v63 }
 0x842   :  { %v1857_v26 = vmul.f32 0.7978846, %v1853_v22  ;;  %v1858_v27 = vmul.f32 0.7978846, %v1854_v23  ;;  %v1847_v13 = vmul.f32 0.044715, %v1843_v24 }
 0x843   :  { %v1848_v28 = vmul.f32 0.044715, %v1844_v25  ;;  %v1880_v22 = vld [vmem:[%s3367_s3 + $0x38] sm:$0xff]  ;;  %v1993_v24 = vand.u32 4294901760, %v3131_v6  ;;  %v1984_v33 = vand.u32 4294901760, %v1983_v21  ;;  %s2894_s3 = smov [#allocation2]  }
 0x844   :  { %2845 = vtanh.f32 %v1857_v26  ;;  %v1851_v16 = vadd.f32 %v1847_v13, %v1835_v17  ;;  %v3162_v13 = vand.u32 4294901760, %v1895_v19  ;;  %s2792_s24 = sshll.u32 %s2894_s3, 4  ;;  %s2793_s24 = int_to_ptr.vmem [resolvable:$true] %s2792_s24 }
 0x845   :  { %2847 = vtanh.f32 %v1858_v27  ;;  %v1852_v30 = vadd.f32 %v1848_v28, %v1836_v18  ;;  %v1994_v36 = vsub.f32 %v3131_v6, %v1993_v24  ;;  %p2870_p1 = scmp.lt.s32.totalorder %s2793_s24, %s2793_s24 }
 0x846   :  { %v1855_v31 = vmul.f32 0.7978846, %v1851_v16 }
 0x847   :  { %v1856_v32 = vmul.f32 0.7978846, %v1852_v30  ;;  %v1898_v30 = vsel %vm1881_vm9, %v1880_v22, 0 }
 0x848   :  { %2849 = vtanh.f32 %v1855_v31 }
 0x849   :  { %2851 = vtanh.f32 %v1856_v32 }
 0x851   :  { %v2846_v41 = vpop.eup %2845 }
 0x852   :  { %v2848_v44 = vpop.eup %2847  ;;  %v1865_v45 = vadd.f32 1.0, %v2846_v41 }
 0x853   :  { %v1866_v49 = vadd.f32 1.0, %v2848_v44  ;;  %v3180_v44 = vsub.f32 %v1895_v19, %v3162_v13 }
 0x854   :  { %v1869_v52 = vmul.f32 0.5, %v1865_v45  ;;  %v3182_v45 = vand.u32 4294901760, %v1898_v30 }
 0x855   :  { %v2850_v54 = vpop.eup %2849  ;;  %v1870_v55 = vmul.f32 0.5, %v1866_v49 }
 0x856   :  { %v2852_v60 = vpop.eup %2851  ;;  %v1873_v61 = vmul.f32 %v1869_v52, %v1837_v2  ;;  %v1863_v48 = vadd.f32 1.0, %v2850_v54  ;;  %v1995_v54 = vand.u32 4294901760, %v1994_v36 }
 0x857   :  { %v1874_v57 = vmul.f32 %v1870_v55, %v1838_v3  ;;  %v1864_v62 = vadd.f32 1.0, %v2852_v60  ;;  %v1972_v3 = vsub.f32 %v3111_v42, %v1971_v58  ;;  %v2015_v60 = vand.u32 4294901760, %v3180_v44 }
 0x858   :  { %v3128_v5 = vand.u32 4294901760, %v1873_v61  ;;  %v1867_v56 = vmul.f32 0.5, %v1863_v48 }
 0x859   :  { %v3135_v10 = vand.u32 4294901760, %v1874_v57  ;;  %v1868_v2 = vmul.f32 0.5, %v1864_v62  ;;  %v1973_v26 = vand.u32 4294901760, %v1972_v3 }
 0x85a   :  { %v1871_v11 = vmul.f32 %v1867_v56, %v1835_v17  ;;  %v3141_v12 = vsub.f32 %v1873_v61, %v3128_v5  ;;  %v3193_v61 = vsub.f32 %v1898_v30, %v3182_v45 }
 0x85b   :  { %1929 = vmatprep.subr.mxu0 %v3135_v10  ;;  %v1872_v29 = vmul.f32 %v1868_v2, %v1836_v18  ;;  %v2064_v20 = vsub.f32 %v1874_v57, %v3135_v10  ;;  %v3158_v18 = vsub.f32 %v1892_v59, %v3133_v9  ;;  %v2016_v57 = vsub.f32 %v3180_v44, %v2015_v60 }
 0x85c   :  { %1931 = vmatpush1.msra.mxu0 %v3128_v5  ;;  %v3153_v17 = vand.u32 4294901760, %v1871_v11  ;;  %v2071_v23 = vand.u32 4294901760, %v3141_v12  ;;  %v2026_v62 = vand.u32 4294901760, %v3193_v61 }
 0x85d   :  { %v3160_v25 = vand.u32 4294901760, %v1872_v29  ;;  %v2065_v27 = vand.u32 4294901760, %v2064_v20  ;;  %v2004_v38 = vand.u32 4294901760, %v3158_v18  ;;  %v2017_v0 = vand.u32 4294901760, %v2016_v57 }
 0x85e   :  { %v2072_v28 = vsub.f32 %v3141_v12, %v2071_v23  ;;  %v3168_v16 = vsub.f32 %v1871_v11, %v3153_v17  ;;  %v2027_v56 = vsub.f32 %v3193_v61, %v2026_v62 }
 0x85f   :  { %1933 = vmatprep.subr.mxu0 %v3160_v25  ;;  %v2066_v31 = vsub.f32 %v2064_v20, %v2065_v27  ;;  %v2076_v32 = vsub.f32 %v1872_v29, %v3160_v25  ;;  %v2005_v59 = vsub.f32 %v3158_v18, %v2004_v38 }
 0x860   :  { %1935 = vmatpush1.msra.mxu0 %v3153_v17  ;;  %v2073_v34 = vand.u32 4294901760, %v2072_v28  ;;  %v2083_v35 = vand.u32 4294901760, %v3168_v16  ;;  %v2028_v2 = vand.u32 4294901760, %v2027_v56 }
 0x861   :  { %1974 = vmatmul.mubr.f32.vlgmr.msra.gmra.mxu0 %v1973_v26  ;;  %2192 = vmatprep.subr.mxu0 %v2064_v20  ;;  %v2067_v41 = vand.u32 4294901760, %v2066_v31  ;;  %v2077_v43 = vand.u32 4294901760, %v2076_v32  ;;  %v2006_v48 = vand.u32 4294901760, %v2005_v59 }
 0x862   :  { %2195 = vmatpush1.msra.mxu0 %v3141_v12  ;;  %1979 = vmatprep.mubr.f32.mxu0 %v2887_v4  ;;  %v2084_v46 = vsub.f32 %v3168_v16, %v2083_v35 }
 0x863   :  { %2068 = vmatprep.subr.mxu1 %v2067_v41  ;;  %2198 = vmatprep.subr.mxu0 %v2076_v32  ;;  %v2078_v49 = vsub.f32 %v2076_v32, %v2077_v43 }
 0x864   :  { %2074 = vmatpush1.msra.mxu1 %v2073_v34  ;;  %2201 = vmatpush1.msra.mxu0 %v3168_v16  ;;  %v2085_v52 = vand.u32 4294901760, %v2084_v46 }
 0x865   :  { %1985 = vmatmul.mubr.f32.gmra.mxu0 %v1984_v33  ;;  %2437 = vmatprep.subr.mxu0 %v2065_v27  ;;  %v2079_v55 = vand.u32 4294901760, %v2078_v49 }
 0x866   :  { %1990 = vmatprep.mubr.f32.mxu0 %v2887_v4 }
 0x867   :  { %2080 = vmatprep.subr.mxu1 %v2079_v55 }
 0x868   :  { %2086 = vmatpush1.msra.mxu1 %v2085_v52 }
 0x869   :  { %1996 = vmatmul.mubr.f32.gmra.mxu0 %v1995_v54  ;;  %2121 = vmatmul.mubr.f32.vlgmr.msra.gmra.mxu1 %v3103_v37 }
 0x86a   :  { %2312 = vmatprep.subr.mxu1 %v3135_v10  ;;  %2001 = vmatprep.mubr.f32.mxu0 %v2887_v4 }
 0x86b   :  { %2314 = vmatpush1.msra.mxu1 %v3128_v5  ;;  %2126 = vmatprep.mubr.f32.mxu1 %v2887_v4 }
 0x86c   :  { %2316 = vmatprep.subr.mxu1 %v3160_v25 }
 0x86d   :  { %2318 = vmatpush1.msra.mxu1 %v3153_v17  ;;  %2007 = vmatmul.mubr.f32.gmra.mxu0 %v2006_v48 }
 0x86e   :  { %2128 = vmatmul.mubr.f32.gmra.mxu1 %v3108_v39  ;;  %2554 = vmatprep.subr.mxu1 %v3135_v10 }
 0x86f   :  { %2012 = vmatprep.mubr.f32.mxu0 %v2887_v4  ;;  %2133 = vmatprep.mubr.f32.mxu1 %v2887_v4 }
 0x871   :  { %2018 = vmatmul.mubr.f32.gmra.mxu0 %v2017_v0 }
 0x872   :  { %2135 = vmatmul.mubr.f32.gmra.mxu1 %v3120_v53  ;;  %2023 = vmatprep.mubr.f32.mxu0 %v2887_v4 }
 0x873   :  { %2140 = vmatprep.mubr.f32.mxu1 %v2887_v4 }
 0x875   :  { %2029 = vmatmul.mubr.f32.gmra.mxu0 %v2028_v2 }
 0x876   :  { %2142 = vmatmul.mubr.f32.gmra.mxu1 %v3133_v9  ;;  %2234 = vmatprep.mubr.f32.mxu0 %v2887_v4 }
 0x877   :  { %2147 = vmatprep.mubr.f32.mxu1 %v2887_v4 }
 0x879   :  { %2237 = vmatmul.mubr.f32.vlgmr.msra.gmra.mxu0 %v3111_v42 }
 0x87a   :  { %2149 = vmatmul.mubr.f32.gmra.mxu1 %v3162_v13  ;;  %2441 = vmatpush1.msra.mxu0 %v2071_v23 }
 0x87b   :  { %2445 = vmatprep.subr.mxu0 %v2077_v43  ;;  %2154 = vmatprep.mubr.f32.mxu1 %v2887_v4 }
 0x87c   :  { %2449 = vmatpush1.msra.mxu0 %v2083_v35  ;;  %2242 = vmatprep.mubr.f32.mxu0 %v2887_v4 }
 0x87d   :  { %2245 = vmatmul.mubr.f32.gmra.mxu0 %v3118_v50 }
 0x87e   :  { %2156 = vmatmul.mubr.f32.gmra.mxu1 %v3182_v45  ;;  %2250 = vmatprep.mubr.f32.mxu0 %v2887_v4 }
 0x87f   :  { %2351 = vmatprep.mubr.f32.mxu1 %v2887_v4 }
 0x881   :  { %2253 = vmatmul.mubr.f32.gmra.mxu0 %v3131_v6 }
 0x882   :  { %2355 = vmatmul.mubr.f32.vlgmr.msra.gmra.mxu1 %v1971_v58  ;;  %2258 = vmatprep.mubr.f32.mxu0 %v2887_v4 }
 0x883   :  { %2556 = vmatpush1.msra.mxu1 %v3128_v5  ;;  %2360 = vmatprep.mubr.f32.mxu1 %v2887_v4 }
 0x884   :  { %2558 = vmatprep.subr.mxu1 %v3160_v25 }
 0x885   :  { %2560 = vmatpush1.msra.mxu1 %v3153_v17  ;;  %2261 = vmatmul.mubr.f32.gmra.mxu0 %v3158_v18 }
 0x886   :  { %2364 = vmatmul.mubr.f32.gmra.mxu1 %v1982_v63  ;;  %2266 = vmatprep.mubr.f32.mxu0 %v2887_v4 }
 0x887   :  { %2369 = vmatprep.mubr.f32.mxu1 %v2887_v4 }
 0x889   :  { %2269 = vmatmul.mubr.f32.gmra.mxu0 %v3180_v44 }
 0x88a   :  { %2373 = vmatmul.mubr.f32.gmra.mxu1 %v1993_v24  ;;  %2274 = vmatprep.mubr.f32.mxu0 %v2887_v4 }
 0x88b   :  { %2378 = vmatprep.mubr.f32.mxu1 %v2887_v4 }
 0x88d   :  { %2277 = vmatmul.mubr.f32.gmra.mxu0 %v3193_v61 }
 0x88e   :  { %2382 = vmatmul.mubr.f32.gmra.mxu1 %v2004_v38  ;;  %2482 = vmatprep.mubr.f32.mxu0 %v2887_v4 }
 0x88f   :  { %2387 = vmatprep.mubr.f32.mxu1 %v2887_v4 }
 0x891   :  { %2484 = vmatmul.mubr.f32.vlgmr.msra.gmra.mxu0 %v3103_v37 }
 0x892   :  { %2391 = vmatmul.mubr.f32.gmra.mxu1 %v2015_v60  ;;  %2489 = vmatprep.mubr.f32.mxu0 %v2887_v4 }
 0x893   :  { %2396 = vmatprep.mubr.f32.mxu1 %v2887_v4 }
 0x895   :  { %2491 = vmatmul.mubr.f32.gmra.mxu0 %v3108_v39 }
 0x896   :  { %2400 = vmatmul.mubr.f32.gmra.mxu1 %v2026_v62  ;;  %2496 = vmatprep.mubr.f32.mxu0 %v2887_v4 }
 0x897   :  { %2593 = vmatprep.mubr.f32.mxu1 %v2887_v4 }
 0x899   :  { %2498 = vmatmul.mubr.f32.gmra.mxu0 %v3120_v53 }
 0x89a   :  { %2595 = vmatmul.mubr.f32.vlgmr.msra.gmra.mxu1 %v3103_v37  ;;  %2503 = vmatprep.mubr.f32.mxu0 %v2887_v4 }
 0x89b   :  { %2600 = vmatprep.mubr.f32.mxu1 %v2887_v4 }
 0x89d   :  { %2505 = vmatmul.mubr.f32.gmra.mxu0 %v3133_v9 }
 0x89e   :  { %2602 = vmatmul.mubr.f32.gmra.mxu1 %v3108_v39  ;;  %2510 = vmatprep.mubr.f32.mxu0 %v2887_v4 }
 0x89f   :  { %2607 = vmatprep.mubr.f32.mxu1 %v2887_v4 }
 0x8a1   :  { %2512 = vmatmul.mubr.f32.gmra.mxu0 %v3162_v13 }
 0x8a2   :  { %2609 = vmatmul.mubr.f32.gmra.mxu1 %v3120_v53  ;;  %2517 = vmatprep.mubr.f32.mxu0 %v2887_v4 }
 0x8a3   :  { %2614 = vmatprep.mubr.f32.mxu1 %v2887_v4 }
 0x8a5   :  { %2519 = vmatmul.mubr.f32.gmra.mxu0 %v3182_v45 }
 0x8a6   :  { %2616 = vmatmul.mubr.f32.gmra.mxu1 %v3133_v9 }
 0x8a7   :  { %2621 = vmatprep.mubr.f32.mxu1 %v2887_v4 }
 0x8aa   :  { %2623 = vmatmul.mubr.f32.gmra.mxu1 %v3162_v13 }
 0x8ab   :  { %2628 = vmatprep.mubr.f32.mxu1 %v2887_v4 }
 0x8ae   :  { %2630 = vmatmul.mubr.f32.gmra.mxu1 %v3182_v45 }
 0x921   :  { %v1975_v37 = vpop.f32.mrf.mxu0 }
 0x923   :  { %v3273_v39 = vpop.f32.mrf.mxu0 }
 0x925   :  { %v3275_v42 = vpop.f32.mrf.mxu0 }
 0x927   :  { %v3277_v50 = vpop.f32.mrf.mxu0 }
 0x929   :  { %v1997_v53 = vpop.f32.mrf.mxu0  ;;  %v2122_v58 = vpop.f32.mrf.mxu1 }
 0x92b   :  { %v1999_v63 = vpop.f32.mrf.mxu0  ;;  %v2124_v5 = vpop.f32.mrf.mxu1 }
 0x92d   :  { %v2008_v6 = vpop.f32.mrf.mxu0 }
 0x92e   :  { %v2129_v9 = vpop.f32.mrf.mxu1 }
 0x92f   :  { %v2010_v10 = vpop.f32.mrf.mxu0 }
 0x930   :  { %v3279_v3 = vpop.f32.mrf.mxu1 }
 0x931   :  { %v3281_v11 = vpop.f32.mrf.mxu0 }
 0x932   :  { %v2136_v4 = vpop.f32.mrf.mxu1 }
 0x933   :  { %v2137_v12 = vadd.f32 %v2136_v4, %v1997_v53  ;;  %v3283_v19 = vpop.f32.mrf.mxu0 }
 0x934   :  { %v2138_v29 = vpop.f32.mrf.mxu1 }
 0x935   :  { %v2139_v20 = vadd.f32 %v2138_v29, %v1999_v63  ;;  %v3285_v21 = vpop.f32.mrf.mxu0 }
 0x936   :  { %v2143_v22 = vpop.f32.mrf.mxu1 }
 0x937   :  { %v2144_v17 = vadd.f32 %v2143_v22, %v2008_v6  ;;  %v3287_v23 = vpop.f32.mrf.mxu0  ;;  %v2123_v6 = vadd.f32 %v2122_v58, %v1975_v37  ;;  %v2125_v22 = vadd.f32 %v2124_v5, %v3273_v39  ;;  %v2132_v37 = vadd.f32 %v3279_v3, %v3277_v50 }
 0x938   :  { %v2145_v24 = vpop.f32.mrf.mxu1 }
 0x939   :  { %v2146_v18 = vadd.f32 %v2145_v24, %v2010_v10  ;;  %v2238_v25 = vpop.f32.mrf.mxu0 }
 0x93a   :  { %v3289_v26 = vpop.f32.mrf.mxu1 }
 0x93b   :  { %v2240_v27 = vpop.f32.mrf.mxu0 }
 0x93c   :  { %v3291_v13 = vpop.f32.mrf.mxu1 }
 0x93d   :  { %v2246_v28 = vpop.f32.mrf.mxu0 }
 0x93e   :  { %v3293_v16 = vpop.f32.mrf.mxu1 }
 0x93f   :  { %v2248_v30 = vpop.f32.mrf.mxu0 }
 0x940   :  { %v3295_v31 = vpop.f32.mrf.mxu1 }
 0x941   :  { %v2254_v32 = vpop.f32.mrf.mxu0 }
 0x942   :  { %v2255_v33 = vadd.f32 %v2254_v32, %v2137_v12  ;;  %v2356_v34 = vpop.f32.mrf.mxu1  ;;  %v2239_v12 = vadd.f32 %v2238_v25, %v2123_v6 }
 0x943   :  { %v2256_v35 = vpop.f32.mrf.mxu0 }
 0x944   :  { %v2257_v36 = vadd.f32 %v2256_v35, %v2139_v20  ;;  %v2358_v38 = vpop.f32.mrf.mxu1  ;;  %v2357_v24 = vadd.f32 %v2356_v34, %v2239_v12 }
 0x945   :  { %v2262_v41 = vpop.f32.mrf.mxu0 }
 0x946   :  { %v2263_v43 = vadd.f32 %v2262_v41, %v2144_v17  ;;  %v2365_v44 = vpop.f32.mrf.mxu1  ;;  %v2130_v17 = vadd.f32 %v2129_v9, %v3275_v42  ;;  %v2249_v42 = vadd.f32 %v2248_v30, %v2132_v37 }
 0x947   :  { %v2264_v45 = vpop.f32.mrf.mxu0 }
 0x948   :  { %v2265_v46 = vadd.f32 %v2264_v45, %v2146_v18  ;;  %v2367_v49 = vpop.f32.mrf.mxu1  ;;  %v2247_v35 = vadd.f32 %v2246_v28, %v2130_v17  ;;  %v2158_v17 = vadd.f32 %v3293_v16, %v3285_v21 }
 0x949   :  { %v2270_v52 = vpop.f32.mrf.mxu0 }
 0x94a   :  { %v2374_v54 = vpop.f32.mrf.mxu1  ;;  %v2366_v25 = vadd.f32 %v2365_v44, %v2247_v35  ;;  %v2151_v44 = vadd.f32 %v3289_v26, %v3281_v11 }
 0x94b   :  { %v2375_v55 = vadd.f32 %v2374_v54, %v2255_v33  ;;  %v3297_v59 = vpop.f32.mrf.mxu0  ;;  %v2241_v33 = vadd.f32 %v2240_v27, %v2125_v22  ;;  %v2153_v22 = vadd.f32 %v3291_v13, %v3283_v19 }
 0x94c   :  { %v2376_v60 = vpop.f32.mrf.mxu1  ;;  %v2271_v12 = vadd.f32 %v2270_v52, %v2151_v44 }
 0x94d   :  { %v2377_v61 = vadd.f32 %v2376_v60, %v2257_v36  ;;  %v3299_v48 = vpop.f32.mrf.mxu0  ;;  %v2359_v58 = vadd.f32 %v2358_v38, %v2241_v33  ;;  %v2273_v11 = vadd.f32 %v3297_v59, %v2153_v22 }
 0x94e   :  { %v2383_v57 = vpop.f32.mrf.mxu1  ;;  %v2279_v26 = vadd.f32 %v3299_v48, %v2158_v17 }
 0x94f   :  { %v2384_v62 = vadd.f32 %v2383_v57, %v2263_v43  ;;  %v3301_v0 = vpop.f32.mrf.mxu0  ;;  %v2368_v57 = vadd.f32 %v2367_v49, %v2249_v42 }
 0x950   :  { %v2385_v56 = vpop.f32.mrf.mxu1 }
 0x951   :  { %v2386_v2 = vadd.f32 %v2385_v56, %v2265_v46  ;;  %v2485_v53 = vpop.f32.mrf.mxu0 }
 0x952   :  { %v2392_v63 = vpop.f32.mrf.mxu1  ;;  %v2486_v36 = vadd.f32 %v2485_v53, %v2357_v24 }
 0x953   :  { %v2487_v10 = vpop.f32.mrf.mxu0  ;;  %v2393_v24 = vadd.f32 %v2392_v63, %v2271_v12 }
 0x954   :  { %v2394_v4 = vpop.f32.mrf.mxu1  ;;  %v2488_v9 = vadd.f32 %v2487_v10, %v2359_v58 }
 0x955   :  { %v2492_v29 = vpop.f32.mrf.mxu0 }
 0x956   :  { %v2401_v20 = vpop.f32.mrf.mxu1  ;;  %v2493_v34 = vadd.f32 %v2492_v29, %v2366_v25 }
 0x957   :  { %v2494_v18 = vpop.f32.mrf.mxu0  ;;  %v2402_v37 = vadd.f32 %v2401_v20, %v2279_v26 }
 0x958   :  { %v3305_v32 = vpop.f32.mrf.mxu1  ;;  %v2495_v3 = vadd.f32 %v2494_v18, %v2368_v57 }
 0x959   :  { %v2499_v41 = vpop.f32.mrf.mxu0 }
 0x95a   :  { %v2500_v43 = vadd.f32 %v2499_v41, %v2375_v55  ;;  %v2596_v45 = vpop.f32.mrf.mxu1 }
 0x95b   :  { %v2597_v46 = vadd.f32 %v2596_v45, %v2486_v36  ;;  %v2501_v54 = vpop.f32.mrf.mxu0  ;;  %v2395_v45 = vadd.f32 %v2394_v4, %v2273_v11 }
 0x95c   :  { %v2502_v39 = vadd.f32 %v2501_v54, %v2377_v61  ;;  %v2598_v5 = vpop.f32.mrf.mxu1 }
 0x95d   :  { %2636 = vrot.lane.b32.xlu1 %v2597_v46, %s2890_s25  ;;  %v2506_v27 = vpop.f32.mrf.mxu0  ;;  %v2599_v55 = vadd.f32 %v2598_v5, %v2488_v9 }
 0x95e   :  { %v2507_v28 = vadd.f32 %v2506_v27, %v2384_v62  ;;  %v2603_v60 = vpop.f32.mrf.mxu1 }
 0x95f   :  { %v2604_v56 = vadd.f32 %v2603_v60, %v2493_v34  ;;  %v2508_v53 = vpop.f32.mrf.mxu0 }
 0x960   :  { %v2509_v6 = vadd.f32 %v2508_v53, %v2386_v2  ;;  %v2605_v50 = vpop.f32.mrf.mxu1 }
 0x961   :  { %2638 = vrot.lane.b32.xlu0 %v2604_v56, %s2890_s25  ;;  %2640 = vrot.lane.b32.xlu1 %v2599_v55, %s2890_s25  ;;  %v2513_v38 = vpop.f32.mrf.mxu0  ;;  %v2606_v61 = vadd.f32 %v2605_v50, %v2495_v3 }
 0x962   :  { %v2610_v30 = vpop.f32.mrf.mxu1  ;;  %v2514_v35 = vadd.f32 %v2513_v38, %v2393_v24 }
 0x963   :  { %v2611_v10 = vadd.f32 %v2610_v30, %v2500_v43  ;;  %v2515_v29 = vpop.f32.mrf.mxu0  ;;  %v2160_v43 = vadd.f32 %v3295_v31, %v3287_v23 }
 0x964   :  { %v2612_v62 = vpop.f32.mrf.mxu1  ;;  %v2516_v16 = vadd.f32 %v2515_v29, %v2395_v45 }
 0x965   :  { %v2613_v49 = vadd.f32 %v2612_v62, %v2502_v39  ;;  %2642 = vrot.lane.b32.xlu0 %v2606_v61, %s2890_s25  ;;  %v2520_v36 = vpop.f32.mrf.mxu0  ;;  %v2281_v21 = vadd.f32 %v3301_v0, %v2160_v43 }
 0x966   :  { %v2617_v2 = vpop.f32.mrf.mxu1  ;;  %v2521_v63 = vadd.f32 %v2520_v36, %v2402_v37 }
 0x967   :  { %v2618_v18 = vadd.f32 %v2617_v2, %v2507_v28  ;;  %v2522_v59 = vpop.f32.mrf.mxu0  ;;  %v2404_v48 = vadd.f32 %v3305_v32, %v2281_v21 }
 0x968   :  { %v2619_v33 = vpop.f32.mrf.mxu1 }
 0x969   :  { %v2620_v52 = vadd.f32 %v2619_v33, %v2509_v6  ;;  %v2523_v39 = vadd.f32 %v2522_v59, %v2404_v48 }
 0x96a   :  { %v2624_v41 = vpop.f32.mrf.mxu1 }
 0x96b   :  { %v2625_v19 = vadd.f32 %v2624_v41, %v2514_v35 }
 0x96c   :  { %v2626_v13 = vpop.f32.mrf.mxu1 }
 0x96d   :  { %2656 = vrot.lane.b32.xlu1 %v2625_v19, %s2891_s1  ;;  %v2627_v25 = vadd.f32 %v2626_v13, %v2516_v16 }
 0x96e   :  { %v2631_v58 = vpop.f32.mrf.mxu1 }
 0x96f   :  { %v2632_v46 = vadd.f32 %v2631_v58, %v2521_v63 }
 0x970   :  { %v2633_v54 = vpop.f32.mrf.mxu1 }
 0x971   :  { %2658 = vrot.lane.b32.xlu0 %v2632_v46, %s2891_s1  ;;  %2660 = vrot.lane.b32.xlu1 %v2627_v25, %s2891_s1  ;;  %v2634_v23 = vadd.f32 %v2633_v54, %v2523_v39 }
 0x975   :  { %2662 = vrot.lane.b32.xlu0 %v2634_v23, %s2891_s1 }
 0x9cf   :  { %v2637_v31 = vpop.permute.xlu1 %2636 }
 0x9d3   :  { %v2639_v0 = vpop.permute.xlu0 %2638  ;;  %v2641_v4 = vpop.permute.xlu1 %2640 }
 0x9d4   :  { %v2646_v20 = vsel %vm1174_vm5, %v2641_v4, %v2637_v31  ;;  %v2644_v32 = vsel %vm1174_vm5, %v2637_v31, %v2641_v4 }
 0x9d5   :  { %v2648_v9 = vmul.f32 %v3013_v7, %v2646_v20  ;;  %v2649_v34 = vmul.f32 %v3016_v8, %v2644_v32 }
 0x9d7   :  { %v2643_v5 = vpop.permute.xlu0 %2642  ;;  %v2652_v55 = vadd.f32 %v2648_v9, %v2611_v10  ;;  %v2653_v50 = vadd.f32 %v2649_v34, %v2613_v49 }
 0x9d8   :  { %v2647_v27 = vsel %vm1174_vm5, %v2643_v5, %v2639_v0  ;;  %v2645_v28 = vsel %vm1174_vm5, %v2639_v0, %v2643_v5 }
 0x9d9   :  { %v2650_v56 = vmul.f32 %v3013_v7, %v2647_v27  ;;  %v2651_v3 = vmul.f32 %v3016_v8, %v2645_v28 }
 0x9db   :  { %v2654_v12 = vadd.f32 %v2650_v56, %v2618_v18  ;;  %v2655_v29 = vadd.f32 %v2651_v3, %v2620_v52 }
 0x9df   :  { %v2657_v42 = vpop.permute.xlu1 %2656 }
 0x9e3   :  { %v2659_v60 = vpop.permute.xlu0 %2658  ;;  %v2661_v57 = vpop.permute.xlu1 %2660 }
 0x9e4   :  { %v2664_v53 = vsel %vm1185_vm8, %v2657_v42, %v2661_v57  ;;  %v2666_v6 = vsel %vm1185_vm8, %v2661_v57, %v2657_v42 }
 0x9e5   :  { %v2668_v38 = vmul.f32 %v3027_v14, %v2664_v53  ;;  %v2669_v30 = vmul.f32 %v3030_v15, %v2666_v6 }
 0x9e7   :  { %v2672_v44 = vadd.f32 %v2668_v38, %v2652_v55  ;;  %v2673_v61 = vadd.f32 %v2669_v30, %v2653_v50  ;;  %v2663_v62 = vpop.permute.xlu0 %2662 }
 0x9e8   :  { %v2665_v7 = vsel %vm1185_vm8, %v2659_v60, %v2663_v62  ;;  %v2667_v10 = vsel %vm1185_vm8, %v2663_v62, %v2659_v60 }
 0x9e9   :  { %v2670_v2 = vmul.f32 %v3027_v14, %v2665_v7  ;;  %v2671_v49 = vmul.f32 %v3030_v15, %v2667_v10  ;;  %v2680_v8 = vadd.f32 %v2673_v61, %v2672_v44  ;;  %v2676_v24 = vmul.f32 %v2672_v44, %v2672_v44 }
 0x9ea   :  { %v2677_v18 = vmul.f32 %v2673_v61, %v2673_v61 }
 0x9eb   :  { %v2674_v22 = vadd.f32 %v2670_v2, %v2654_v12  ;;  %v2675_v17 = vadd.f32 %v2671_v49, %v2655_v29  ;;  %2681 = vadd.xlane.f32.xlu1 %v2680_v8 }
 0x9ec   :  { %v2686_v36 = vadd.f32 %v2677_v18, %v2676_v24 }
 0x9ed   :  { %v2683_v33 = vadd.f32 %v2675_v17, %v2674_v22  ;;  %v2678_v11 = vmul.f32 %v2674_v22, %v2674_v22  ;;  %v2679_v26 = vmul.f32 %v2675_v17, %v2675_v17 }
 0x9ef   :  { %2684 = vadd.xlane.f32.xlu0 %v2683_v33  ;;  %v2689_v35 = vadd.f32 %v2679_v26, %v2678_v11 }
 0x9f1   :  { %2690 = vadd.xlane.f32.xlu1 %v2689_v35 }
 0x9f3   :  { %2687 = vadd.xlane.f32.xlu0 %v2686_v36 }
 0xa74   :  { %v2682_v1 = vpop.xlane.xlu1 %2681 }
 0xa75   :  { %v2692_v41 = vmul.f32 0.00390625, %v2682_v1 }
 0xa77   :  { %v2696_v19 = vmul.f32 %v2692_v41, %v2692_v41 }
 0xa78   :  { %v2685_v52 = vpop.xlane.xlu0 %2684 }
 0xa79   :  { %v2693_v14 = vmul.f32 0.00390625, %v2685_v52 }
 0xa7a   :  { %v2691_v43 = vpop.xlane.xlu1 %2690 }
 0xa7b   :  { %v2697_v15 = vmul.f32 %v2693_v14, %v2693_v14  ;;  %v2695_v45 = vmul.f32 0.00390625, %v2691_v43 }
 0xa7c   :  { %v2688_v37 = vpop.xlane.xlu0 %2687 }
 0xa7d   :  { %v2699_v13 = vsub.f32 %v2695_v45, %v2697_v15  ;;  %v2694_v21 = vmul.f32 0.00390625, %v2688_v37 }
 0xa7f   :  { %v2701_v16 = vadd.f32 1e-05, %v2699_v13  ;;  %v2698_v63 = vsub.f32 %v2694_v21, %v2696_v19 }
 0xa81   :  { %2853 = vrsqrt.f32 %v2701_v16  ;;  %v2700_v59 = vadd.f32 1e-05, %v2698_v63 }
 0xa83   :  { %2855 = vrsqrt.f32 %v2700_v59 }
 0xa8e   :  { %v2854_v58 = vpop.eup %2853 }
 0xa8f   :  { %v2705_v48 = vmul.f32 %v2854_v58, %v3077_v47 }
 0xa90   :  { %v2856_v25 = vpop.eup %2855 }
 0xa91   :  { %v2707_v46 = vmul.f32 %v2705_v48, %v2693_v14  ;;  %v2704_v54 = vmul.f32 %v2856_v25, %v3083_v51 }
 0xa93   :  { %2712 = vrot.lane.b32.xlu1 %v2707_v46, %s2890_s25  ;;  %v2706_v39 = vmul.f32 %v2704_v54, %v2692_v41 }
 0xa95   :  { %2710 = vrot.lane.b32.xlu0 %v2706_v39, %s2890_s25  ;;  %s2865_s25 = scalar_lea.vmem %s2793_s24, 512 }
 0xa96   :  { %p2866_p0 = scmp.ne.s32.totalorder %s2793_s24, %s2865_s25  ;;  %p2871_p2 = scmp.lt.s32.totalorder %s2865_s25, %s2865_s25 }
 0xa97   :  { %2720 = vperm.xlu1 %2825, %v2704_v54  }
 0xa98   :  { %p2872_p3 = por %p2871_p2, %p2870_p1 }
 0xa99   :  { %2725 = vperm.xlu0 %2826, %v2705_v48  }
 0xa9a   :  { %p2873_p4 = pnand %p2872_p3, %p2866_p0 }
 0xa9b   :  { %2827 = vset.pattern.permute.xlu1 %v2893_v40 }
 0xa9d   :  { %2828 = vset.pattern.permute.xlu0 %v2893_v40 }
 0xb05   :  { %v2713_v0 = vpop.permute.xlu1 %2712 }
 0xb06   :  { %v2717_v4 = vsub.f32 %v3077_v47, %v2713_v0 }
 0xb07   :  { %v2711_v23 = vpop.permute.xlu0 %2710 }
 0xb08   :  { %v2716_v31 = vsub.f32 %v3083_v51, %v2711_v23 }
 0xb0a   :  { %2734 = vperm.xlu1 %2827, %v2716_v31  }
 0xb0e   :  { %2739 = vperm.xlu1 %2827, %v2717_v4  }
 0xb12   :  { %v2721_v20 = vpop.permute.xlu1 %2720 }
 0xb13   :  { %v2728_v32 = vmul.f32 %v2721_v20, %v2672_v44  ;;  %v2729_v5 = vmul.f32 %v2721_v20, %v2673_v61 }
 0xb14   :  { %v2726_v42 = vpop.permute.xlu0 %2725 }
 0xb15   :  { %v2730_v28 = vmul.f32 %v2726_v42, %v2674_v22  ;;  %v2731_v60 = vmul.f32 %v2726_v42, %v2675_v17 }
 0xb85   :  { %v2735_v9 = vpop.permute.xlu1 %2734 }
 0xb86   :  { %v2742_v34 = vadd.f32 %v2735_v9, %v2728_v32  ;;  %v2743_v27 = vadd.f32 %v2735_v9, %v2729_v5 }
 0xb88   :  { %v2746_v57 = vmul.f32 %v2742_v34, %v2742_v34  ;;  %v2747_v55 = vmul.f32 %v2743_v27, %v2743_v27 }
 0xb89   :  { %v2740_v40 = vpop.permute.xlu1 %2739 }
 0xb8a   :  { %v2750_v56 = vmul.f32 %v2746_v57, %v2742_v34  ;;  %v2751_v53 = vmul.f32 %v2747_v55, %v2743_v27  ;;  %v2744_v51 = vadd.f32 %v2740_v40, %v2730_v28  ;;  %v2745_v6 = vadd.f32 %v2740_v40, %v2731_v60 }
 0xb8c   :  { %v2754_v50 = vmul.f32 0.044715, %v2750_v56  ;;  %v2755_v3 = vmul.f32 0.044715, %v2751_v53  ;;  %v2748_v47 = vmul.f32 %v2744_v51, %v2744_v51  ;;  %v2749_v38 = vmul.f32 %v2745_v6, %v2745_v6 }
 0xb8e   :  { %v2758_v30 = vadd.f32 %v2754_v50, %v2742_v34  ;;  %v2759_v44 = vadd.f32 %v2755_v3, %v2743_v27  ;;  %v2752_v61 = vmul.f32 %v2748_v47, %v2744_v51  ;;  %v2753_v62 = vmul.f32 %v2749_v38, %v2745_v6 }
 0xb90   :  { %v2762_v12 = vmul.f32 0.7978846, %v2758_v30  ;;  %v2763_v7 = vmul.f32 0.7978846, %v2759_v44  ;;  %v2756_v10 = vmul.f32 0.044715, %v2752_v61 }
 0xb91   :  { %v2757_v29 = vmul.f32 0.044715, %v2753_v62 }
 0xb92   :  { %2857 = vtanh.f32 %v2762_v12  ;;  %v2760_v2 = vadd.f32 %v2756_v10, %v2744_v51 }
 0xb93   :  { %2859 = vtanh.f32 %v2763_v7  ;;  %v2761_v49 = vadd.f32 %v2757_v29, %v2745_v6 }
 0xb94   :  { %v2764_v8 = vmul.f32 0.7978846, %v2760_v2 }
 0xb95   :  { %v2765_v22 = vmul.f32 0.7978846, %v2761_v49 }
 0xb96   :  { %2861 = vtanh.f32 %v2764_v8 }
 0xb97   :  { %2863 = vtanh.f32 %v2765_v22 }
 0xb9f   :  { %v2858_v17 = vpop.eup %2857 }
 0xba0   :  { %v2860_v24 = vpop.eup %2859  ;;  %v2770_v33 = vadd.f32 1.0, %v2858_v17 }
 0xba1   :  { %v2771_v11 = vadd.f32 1.0, %v2860_v24 }
 0xba2   :  { %v2774_v26 = vmul.f32 0.5, %v2770_v33 }
 0xba3   :  { %v2862_v18 = vpop.eup %2861  ;;  %v2775_v35 = vmul.f32 0.5, %v2771_v11 }
 0xba4   :  { %v2864_v36 = vpop.eup %2863  ;;  %v2778_v1 = vmul.f32 %v2774_v26, %v2742_v34  ;;  %v2772_v52 = vadd.f32 1.0, %v2862_v18 }
 0xba5   :  { %v2779_v41 = vmul.f32 %v2775_v35, %v2743_v27  ;;  %v2773_v14 = vadd.f32 1.0, %v2864_v36 }
 0xba6   :  { %2782 = vst [vmem:[#allocation2] sm:$0xff] %v2778_v1  ;;  %v2776_v43 = vmul.f32 0.5, %v2772_v52 }
 0xba7   :  { %2785 = vst [vmem:[#allocation2 + $0x10] sm:$0xff] %v2779_v41  ;;  %v2777_v15 = vmul.f32 0.5, %v2773_v14 }
 0xba8   :  { %v2780_v45 = vmul.f32 %v2776_v43, %v2744_v51 }
 0xba9   :  { %v2781_v37 = vmul.f32 %v2777_v15, %v2745_v6 }
 0xbaa   :  { %2783 = vst [vmem:[#allocation2 + $0x8] sm:$0xff] %v2780_v45 }
 0xbab   :  { %2786 = vst [vmem:[#allocation2 + $0x18] sm:$0xff] %v2781_v37 }
 0xbac   :  { %2876 = shalt.err (!%p2873_p4)
}
 0xbad   :  { %s2895_s2 = smov 128   ;;  %s2896_s26 = smov 8  }
 0xbae   :  { %2798 = dma.vmem_to_hbm [thread:$0]  %s2793_s24, 512, %s3369_s5, [#allocation3], %s2895_s2, %s2895_s2, %s2896_s26  }
 0xbaf   :  { %2885 = dma.done.wait [#allocation3], 512  }
 0xbb0   :  { %2886 = vsyncadd [#allocation3], 4294966784 }
 0xbb1   :  { %2802 = vsyncpa [#allocation3], 1 }

</bundles_post_ra>
